<compile_context>
chip_gen: v7x
topology: tpu7x:2x2x1
jax: 0.10.0
libtpu: 0.0.40
codegen_flags: <defaults>
</compile_context>

<pallas_src>
import jax
import jax.numpy as jnp
import numpy as np
from jax import lax
from jax.experimental import pallas as pl
from jax.experimental.pallas import tpu as pltpu


# ----------------------------------------------------------------------------
# Fused kernel: input projection + NH interleaved GRU recurrences + FC head.
# Processes one 8-row batch block per grid step.
# ----------------------------------------------------------------------------
def _fused_kernel(x_ref, wih_ref, whh_ref, xb_ref, bhn_ref,
                  w1_ref, b1_ref, w2_ref, b2_ref, o_ref, xg_scr):
    """x_ref: (T*8, D) time-grouped rows for one batch block of 8 rows."""
    Bp = o_ref.shape[0]                      # 8 (one sublane group)
    T = x_ref.shape[0] // Bp
    GP = bhn_ref.shape[-1]                   # padded per-gate width (mult of 128)

    # Input projections for every head / gate / timestep: one MXU matmul.
    # b_ih (+ b_hh for r,z) is already folded into xb.  Result goes straight
    # to VMEM scratch so it is NOT register-carried across the unrolled loop.
    xg_scr[...] = (jnp.dot(x_ref[...].astype(jnp.float32), wih_ref[...],
                           preferred_element_type=jnp.float32)
                   + xb_ref[...])            # (T*8, 3*GP)

    # Hoist the n-gate b_hh broadcast out of the loop (no CSE of broadcasts).
    bhn_b = jnp.broadcast_to(bhn_ref[...], (Bp, GP))

    # Sequential recurrence, all heads interleaved; h is the only loop carry.
    # whh is referenced per-gate from VMEM inside the loop (short live ranges).
    h = jnp.zeros((Bp, GP), jnp.float32)
    for t in range(T):                       # static unroll (T small & fixed)
        xg_t = xg_scr[t * Bp:(t + 1) * Bp, :]                       # (8, 3*GP)
        hg_r = jnp.dot(h, whh_ref[:, 0:GP],
                       preferred_element_type=jnp.float32)
        hg_z = jnp.dot(h, whh_ref[:, GP:2 * GP],
                       preferred_element_type=jnp.float32)
        hg_n = jnp.dot(h, whh_ref[:, 2 * GP:3 * GP],
                       preferred_element_type=jnp.float32)
        r = jax.nn.sigmoid(xg_t[:, 0:GP] + hg_r)
        z = jax.nn.sigmoid(xg_t[:, GP:2 * GP] + hg_z)
        n = jnp.tanh(xg_t[:, 2 * GP:3 * GP] + r * (hg_n + bhn_b))
        h = (1.0 - z) * n + z * h

    # Fused FC head: Linear(NH*H -> 128) -> ReLU -> [Dropout: identity]
    # -> Linear(128 -> 1, lane-padded to 128 so the store is a full vreg).
    h1 = jnp.maximum(jnp.dot(h, w1_ref[...],
                             preferred_element_type=jnp.float32) + b1_ref[...],
                     0.0)
    out = jnp.dot(h1, w2_ref[...],
                  preferred_element_type=jnp.float32) + b2_ref[...]  # (8, 128)
    o_ref[...] = out.astype(o_ref.dtype)


# ----------------------------------------------------------------------------
# One-time repack of PyTorch-layout weights into the kernel layout.
# ----------------------------------------------------------------------------
def pack_params(params):
    w_ih, w_hh = params['w_ih'], params['w_hh']      # (NH,3H,D), (NH,3H,H)
    b_ih, b_hh = params['b_ih'], params['b_hh']      # (NH,1,3H)
    w1, b1 = params['w1'], params['b1']              # (128, NH*H), (1,128)
    w2, b2 = params['w2'], params['b2']              # (1,128), (1,1)
    NH, G, D = w_ih.shape
    H = G // 3
    NHH = NH * H
    GP = ((NHH + 127) // 128) * 128                  # per-gate width, lane aligned

    eye = jnp.eye(NH, dtype=jnp.float32)
    wih_cols, whh_cols, xb_cols = [], [], []
    for g in range(3):                               # gate order (r, z, n) == torch
        # Input weights, head-major columns: (D, NH*H) -> pad -> (D, GP).
        wih_g = jnp.transpose(w_ih[:, g * H:(g + 1) * H, :], (2, 0, 1)).reshape(D, NHH)
        wih_cols.append(jnp.pad(wih_g, ((0, 0), (0, GP - NHH))))
        # Recurrent weights: block-diagonal over heads, pre-transposed so the
        # kernel uses a plain (h @ W) matmul.
        blk = jnp.transpose(w_hh[:, g * H:(g + 1) * H, :], (0, 2, 1))  # (NH,H,H)
        whh_g = (eye[:, None, :, None] * blk[:, :, None, :]).reshape(NHH, NHH)
        whh_cols.append(jnp.pad(whh_g, ((0, GP - NHH), (0, GP - NHH))))
        # Biases: fold b_ih (+ b_hh for r,z) into the input projection.
        xb_g = b_ih[:, 0, g * H:(g + 1) * H].reshape(NHH)
        if g < 2:
            xb_g = xb_g + b_hh[:, 0, g * H:(g + 1) * H].reshape(NHH)
        xb_cols.append(jnp.pad(xb_g, (0, GP - NHH)))

    # FC head: pre-transpose so the kernel does plain (h @ W) matmuls, and
    # lane-pad the final projection to 128 columns for an unmasked store.
    w1p = jnp.pad(w1, ((0, 0), (0, GP - NHH))).T                       # (GP, 128)
    w2p = jnp.pad(w2.T, ((0, 0), (0, 127)))                            # (128, 128)
    b2p = jnp.pad(b2, ((0, 0), (0, 127)))                              # (1, 128)

    return dict(
        wih=jnp.concatenate(wih_cols, axis=1),                         # (D, 3*GP)
        whh=jnp.concatenate(whh_cols, axis=1),                         # (GP, 3*GP)
        xb=jnp.concatenate(xb_cols)[None, :],                          # (1, 3*GP)
        bhn=jnp.pad(b_hh[:, 0, 2 * H:3 * H].reshape(NHH),
                    (0, GP - NHH))[None, :],                           # (1, GP)
        w1=w1p, b1=b1, w2=w2p, b2=b2p,
    )


# ----------------------------------------------------------------------------
# Python wrapper.  Pads B to a multiple of 8, lays x out batch-block-major /
# time-grouped, runs one grid step per 8-row batch block ("parallel" axis so
# v7x can shard blocks across both TensorCores), and slices the padding off.
# ----------------------------------------------------------------------------
@jax.jit
def multi_head_gru_forward(x, packed):
    """x: (B, T, D) float32.  Returns (B,) float32."""
    B, T, D = x.shape
    Bp = ((B + 7) // 8) * 8
    NB = Bp // 8
    GP = packed['bhn'].shape[-1]

    xp = jnp.pad(x, ((0, Bp - B), (0, 0), (0, 0)))                     # (Bp, T, D)
    # x3[bb, t*8 + i, :] = xp[bb*8 + i, t, :]  (contiguous 8-row tile per step)
    x3 = xp.reshape(NB, 8, T, D).transpose(0, 2, 1, 3).reshape(NB, T * 8, D)

    full = lambda a: pl.BlockSpec(a.shape, lambda bb: (0,) * a.ndim)

    out = pl.pallas_call(
        _fused_kernel,
        out_shape=jax.ShapeDtypeStruct((NB, 8, 128), jnp.float32),
        grid=(NB,),
        in_specs=[
            pl.BlockSpec((None, T * 8, D), lambda bb: (bb, 0, 0)),     # x block
            full(packed['wih']), full(packed['whh']),
            full(packed['xb']), full(packed['bhn']),
            full(packed['w1']), full(packed['b1']),
            full(packed['w2']), full(packed['b2']),
        ],
        out_specs=pl.BlockSpec((None, 8, 128), lambda bb: (bb, 0, 0)),
        scratch_shapes=[pltpu.VMEM((T * 8, 3 * GP), jnp.float32)],
        compiler_params=pltpu.CompilerParams(
            dimension_semantics=("parallel",)),
    )(x3, packed['wih'], packed['whh'], packed['xb'], packed['bhn'],
      packed['w1'], packed['b1'], packed['w2'], packed['b2'])

    # Column 0 holds the prediction; drop batch-padding rows.
    return out[:, :, 0].reshape(Bp)[:B]


# ----------------------------------------------------------------------------
# Deterministic parameter init (PyTorch-style uniform ranges), pure-JAX ref.
# ----------------------------------------------------------------------------
def init_params(key, input_dim, hidden_dim, num_heads):
    ks = jax.random.split(key, 8)
    k_gru = 1.0 / np.sqrt(hidden_dim)
    w_ih = jax.random.uniform(ks[0], (num_heads, 3 * hidden_dim, input_dim),
                              jnp.float32, -k_gru, k_gru)
    w_hh = jax.random.uniform(ks[1], (num_heads, 3 * hidden_dim, hidden_dim),
                              jnp.float32, -k_gru, k_gru)
    b_ih = jax.random.uniform(ks[2], (num_heads, 1, 3 * hidden_dim),
                              jnp.float32, -k_gru, k_gru)
    b_hh = jax.random.uniform(ks[3], (num_heads, 1, 3 * hidden_dim),
                              jnp.float32, -k_gru, k_gru)
    fan1 = hidden_dim * num_heads
    k1 = 1.0 / np.sqrt(fan1)
    w1 = jax.random.uniform(ks[4], (128, fan1), jnp.float32, -k1, k1)
    b1 = jax.random.uniform(ks[5], (1, 128), jnp.float32, -k1, k1)
    k2 = 1.0 / np.sqrt(128)
    w2 = jax.random.uniform(ks[6], (1, 128), jnp.float32, -k2, k2)
    b2 = jax.random.uniform(ks[7], (1, 1), jnp.float32, -k2, k2)
    return dict(w_ih=w_ih, w_hh=w_hh, b_ih=b_ih, b_hh=b_hh,
                w1=w1, b1=b1, w2=w2, b2=b2)


def reference_forward(x, params):
    """Pure-JAX reference mirroring torch.nn.GRU + the FC head."""
    B, T, D = x.shape
    NH, G, _ = params['w_ih'].shape
    H = G // 3
    heads = []
    for hd in range(NH):
        wih = params['w_ih'][hd]
        whh = params['w_hh'][hd]
        bih = params['b_ih'][hd, 0]
        bhh = params['b_hh'][hd, 0]

        def step(h, x_t):
            gi = x_t @ wih.T + bih
            gh = h @ whh.T + bhh
            r = jax.nn.sigmoid(gi[:, :H] + gh[:, :H])
            z = jax.nn.sigmoid(gi[:, H:2 * H] + gh[:, H:2 * H])
            n = jnp.tanh(gi[:, 2 * H:] + r * gh[:, 2 * H:])
            h_new = (1.0 - z) * n + z * h
            return h_new, None

        h0 = jnp.zeros((B, H), jnp.float32)
        h_last, _ = lax.scan(step, h0, jnp.transpose(x, (1, 0, 2)))
        heads.append(h_last)
    combined = jnp.concatenate(heads, axis=-1)
    h1 = jnp.maximum(combined @ params['w1'].T + params['b1'][0], 0.0)
    out = h1 @ params['w2'].T + params['b2'][0]
    return out[:, 0]


if __name__ == "__main__":
    B, T, D = 2, 8, 4        # batch, sequence_length, input_dim
    H, NH = 32, 3            # hidden_dim, num_heads (num_layers=1)

    key = jax.random.PRNGKey(0)
    k_x, k_p = jax.random.split(key)
    x = jax.random.normal(k_x, (B, T, D), jnp.float32)
    params = init_params(k_p, D, H, NH)
    packed = pack_params(params)

    out = multi_head_gru_forward(x, packed)
    out = jax.block_until_ready(out)

    ref = reference_forward(x, params)
    assert out.shape == (B,)
    np.testing.assert_allclose(np.asarray(out), np.asarray(ref),
                               rtol=1e-4, atol=1e-4)
    print("KERNEL_OK")
</pallas_src>

<mosaic_0001>
module attributes {stable_mosaic.version = 11 : i64} {
  func.func @_fused_kernel(%arg0: i32, %arg1: memref<1x64x4xf32, #tpu.memory_space<vmem>>, %arg2: memref<4x384xf32, #tpu.memory_space<vmem>>, %arg3: memref<128x384xf32, #tpu.memory_space<vmem>>, %arg4: memref<1x384xf32, #tpu.memory_space<vmem>>, %arg5: memref<1x128xf32, #tpu.memory_space<vmem>>, %arg6: memref<128x128xf32, #tpu.memory_space<vmem>>, %arg7: memref<1x128xf32, #tpu.memory_space<vmem>>, %arg8: memref<128x128xf32, #tpu.memory_space<vmem>>, %arg9: memref<1x128xf32, #tpu.memory_space<vmem>>, %arg10: memref<1x8x128xf32, #tpu.memory_space<vmem>>, %arg11: memref<64x384xf32, #tpu.memory_space<vmem>>) attributes {dimension_semantics = [#tpu.dimension_semantics<parallel>], iteration_bounds = array<i64: 1>, scalar_prefetch = 0 : i64, scratch_operands = 1 : i64, tpu.core_type = #tpu.core_type<tc>, window_params = [{transform_indices = @transform_0, window_bounds = array<i64: 1, 64, 4>}, {pipeline_mode = #tpu.pipeline_mode<synchronous>, transform_indices = @transform_1, window_bounds = array<i64: 4, 384>}, {pipeline_mode = #tpu.pipeline_mode<synchronous>, transform_indices = @transform_2, window_bounds = array<i64: 128, 384>}, {pipeline_mode = #tpu.pipeline_mode<synchronous>, transform_indices = @transform_3, window_bounds = array<i64: 1, 384>}, {pipeline_mode = #tpu.pipeline_mode<synchronous>, transform_indices = @transform_4, window_bounds = array<i64: 1, 128>}, {pipeline_mode = #tpu.pipeline_mode<synchronous>, transform_indices = @transform_5, window_bounds = array<i64: 128, 128>}, {pipeline_mode = #tpu.pipeline_mode<synchronous>, transform_indices = @transform_6, window_bounds = array<i64: 1, 128>}, {pipeline_mode = #tpu.pipeline_mode<synchronous>, transform_indices = @transform_7, window_bounds = array<i64: 128, 128>}, {pipeline_mode = #tpu.pipeline_mode<synchronous>, transform_indices = @transform_8, window_bounds = array<i64: 1, 128>}, {transform_indices = @transform_9, window_bounds = array<i64: 1, 8, 128>}]} {
    %c0 = arith.constant 0 : index
    %c0_0 = arith.constant 0 : index
    %c0_1 = arith.constant 0 : index
    %0 = vector.load %arg1[%c0, %c0_0, %c0_1] : memref<1x64x4xf32, #tpu.memory_space<vmem>>, vector<1x64x4xf32>
    %1 = vector.shape_cast %0 : vector<1x64x4xf32> to vector<64x4xf32>
    %c0_2 = arith.constant 0 : index
    %c0_3 = arith.constant 0 : index
    %2 = vector.load %arg2[%c0_2, %c0_3] : memref<4x384xf32, #tpu.memory_space<vmem>>, vector<4x384xf32>
    %cst = arith.constant dense<0.000000e+00> : vector<64x384xf32>
    %3 = tpu.matmul %1, %2, %cst {dimension_numbers = #tpu.dot_dimension_numbers<[1], [0], [0], [1], [0, 0, 1, 1], [], []>} : vector<64x4xf32>, vector<4x384xf32>, vector<64x384xf32> -> vector<64x384xf32>
    %c0_4 = arith.constant 0 : index
    %c0_5 = arith.constant 0 : index
    %4 = vector.load %arg4[%c0_4, %c0_5] : memref<1x384xf32, #tpu.memory_space<vmem>>, vector<1x384xf32>
    %5 = vector.broadcast %4 : vector<1x384xf32> to vector<64x384xf32>
    %6 = arith.addf %3, %5 : vector<64x384xf32>
    %c0_6 = arith.constant 0 : index
    %c0_7 = arith.constant 0 : index
    %7 = vector.load %arg11[%c0_6, %c0_7] : memref<64x384xf32, #tpu.memory_space<vmem>>, vector<64x384xf32>
    tpu.vector_store %arg11[%c0_6, %c0_7], %6 {strides = array<i32>} : memref<64x384xf32, #tpu.memory_space<vmem>>, vector<64x384xf32>,
    %c0_8 = arith.constant 0 : index
    %c0_9 = arith.constant 0 : index
    %8 = vector.load %arg5[%c0_8, %c0_9] : memref<1x128xf32, #tpu.memory_space<vmem>>, vector<1x128xf32>
    %9 = vector.shape_cast %8 : vector<1x128xf32> to vector<1x128xf32>
    %10 = vector.broadcast %9 : vector<1x128xf32> to vector<8x128xf32>
    %cst_10 = arith.constant 0.000000e+00 : f32
    %11 = vector.broadcast %cst_10 : f32 to vector<8x128xf32>
    %c0_11 = arith.constant 0 : index
    %c0_12 = arith.constant 0 : index
    %12 = vector.load %arg11[%c0_11, %c0_12] : memref<64x384xf32, #tpu.memory_space<vmem>>, vector<8x384xf32>
    %c0_13 = arith.constant 0 : index
    %c0_14 = arith.constant 0 : index
    %13 = vector.load %arg3[%c0_13, %c0_14] : memref<128x384xf32, #tpu.memory_space<vmem>>, vector<128x128xf32>
    %cst_15 = arith.constant dense<0.000000e+00> : vector<8x128xf32>
    %14 = tpu.matmul %11, %13, %cst_15 {dimension_numbers = #tpu.dot_dimension_numbers<[1], [0], [0], [1], [0, 0, 1, 1], [], []>} : vector<8x128xf32>, vector<128x128xf32>, vector<8x128xf32> -> vector<8x128xf32>
    %c0_16 = arith.constant 0 : index
    %c128 = arith.constant 128 : index
    %15 = vector.load %arg3[%c0_16, %c128] : memref<128x384xf32, #tpu.memory_space<vmem>>, vector<128x128xf32>
    %cst_17 = arith.constant dense<0.000000e+00> : vector<8x128xf32>
    %16 = tpu.matmul %11, %15, %cst_17 {dimension_numbers = #tpu.dot_dimension_numbers<[1], [0], [0], [1], [0, 0, 1, 1], [], []>} : vector<8x128xf32>, vector<128x128xf32>, vector<8x128xf32> -> vector<8x128xf32>
    %c0_18 = arith.constant 0 : index
    %c256 = arith.constant 256 : index
    %17 = vector.load %arg3[%c0_18, %c256] : memref<128x384xf32, #tpu.memory_space<vmem>>, vector<128x128xf32>
    %cst_19 = arith.constant dense<0.000000e+00> : vector<8x128xf32>
    %18 = tpu.matmul %11, %17, %cst_19 {dimension_numbers = #tpu.dot_dimension_numbers<[1], [0], [0], [1], [0, 0, 1, 1], [], []>} : vector<8x128xf32>, vector<128x128xf32>, vector<8x128xf32> -> vector<8x128xf32>
    %19 = vector.extract_strided_slice %12 {offsets = [0, 0], sizes = [8, 128], strides = [1, 1]} : vector<8x384xf32> to vector<8x128xf32>
    %20 = arith.addf %19, %14 : vector<8x128xf32>
    %21 = arith.negf %20 : vector<8x128xf32>
    %22 = math.exp %21 : vector<8x128xf32>
    %cst_20 = arith.constant 1.000000e+00 : f32
    %23 = vector.broadcast %cst_20 : f32 to vector<8x128xf32>
    %24 = arith.addf %23, %22 : vector<8x128xf32>
    %25 = arith.divf %23, %24 : vector<8x128xf32>
    %26 = vector.extract_strided_slice %12 {offsets = [0, 128], sizes = [8, 128], strides = [1, 1]} : vector<8x384xf32> to vector<8x128xf32>
    %27 = arith.addf %26, %16 : vector<8x128xf32>
    %28 = arith.negf %27 : vector<8x128xf32>
    %29 = math.exp %28 : vector<8x128xf32>
    %cst_21 = arith.constant 1.000000e+00 : f32
    %30 = vector.broadcast %cst_21 : f32 to vector<8x128xf32>
    %31 = arith.addf %30, %29 : vector<8x128xf32>
    %32 = arith.divf %30, %31 : vector<8x128xf32>
    %33 = vector.extract_strided_slice %12 {offsets = [0, 256], sizes = [8, 128], strides = [1, 1]} : vector<8x384xf32> to vector<8x128xf32>
    %34 = arith.addf %18, %10 : vector<8x128xf32>
    %35 = arith.mulf %25, %34 : vector<8x128xf32>
    %36 = arith.addf %33, %35 : vector<8x128xf32>
    %37 = math.tanh %36 : vector<8x128xf32>
    %cst_22 = arith.constant 1.000000e+00 : f32
    %38 = vector.broadcast %cst_22 : f32 to vector<8x128xf32>
    %39 = arith.subf %38, %32 : vector<8x128xf32>
    %40 = arith.mulf %39, %37 : vector<8x128xf32>
    %41 = arith.mulf %32, %11 : vector<8x128xf32>
    %42 = arith.addf %40, %41 : vector<8x128xf32>
    %c8 = arith.constant 8 : index
    %c0_23 = arith.constant 0 : index
    %43 = vector.load %arg11[%c8, %c0_23] : memref<64x384xf32, #tpu.memory_space<vmem>>, vector<8x384xf32>
    %c0_24 = arith.constant 0 : index
    %c0_25 = arith.constant 0 : index
    %44 = vector.load %arg3[%c0_24, %c0_25] : memref<128x384xf32, #tpu.memory_space<vmem>>, vector<128x128xf32>
    %cst_26 = arith.constant dense<0.000000e+00> : vector<8x128xf32>
    %45 = tpu.matmul %42, %44, %cst_26 {dimension_numbers = #tpu.dot_dimension_numbers<[1], [0], [0], [1], [0, 0, 1, 1], [], []>} : vector<8x128xf32>, vector<128x128xf32>, vector<8x128xf32> -> vector<8x128xf32>
    %c0_27 = arith.constant 0 : index
    %c128_28 = arith.constant 128 : index
    %46 = vector.load %arg3[%c0_27, %c128_28] : memref<128x384xf32, #tpu.memory_space<vmem>>, vector<128x128xf32>
    %cst_29 = arith.constant dense<0.000000e+00> : vector<8x128xf32>
    %47 = tpu.matmul %42, %46, %cst_29 {dimension_numbers = #tpu.dot_dimension_numbers<[1], [0], [0], [1], [0, 0, 1, 1], [], []>} : vector<8x128xf32>, vector<128x128xf32>, vector<8x128xf32> -> vector<8x128xf32>
    %c0_30 = arith.constant 0 : index
    %c256_31 = arith.constant 256 : index
    %48 = vector.load %arg3[%c0_30, %c256_31] : memref<128x384xf32, #tpu.memory_space<vmem>>, vector<128x128xf32>
    %cst_32 = arith.constant dense<0.000000e+00> : vector<8x128xf32>
    %49 = tpu.matmul %42, %48, %cst_32 {dimension_numbers = #tpu.dot_dimension_numbers<[1], [0], [0], [1], [0, 0, 1, 1], [], []>} : vector<8x128xf32>, vector<128x128xf32>, vector<8x128xf32> -> vector<8x128xf32>
    %50 = vector.extract_strided_slice %43 {offsets = [0, 0], sizes = [8, 128], strides = [1, 1]} : vector<8x384xf32> to vector<8x128xf32>
    %51 = arith.addf %50, %45 : vector<8x128xf32>
    %52 = arith.negf %51 : vector<8x128xf32>
    %53 = math.exp %52 : vector<8x128xf32>
    %cst_33 = arith.constant 1.000000e+00 : f32
    %54 = vector.broadcast %cst_33 : f32 to vector<8x128xf32>
    %55 = arith.addf %54, %53 : vector<8x128xf32>
    %56 = arith.divf %54, %55 : vector<8x128xf32>
    %57 = vector.extract_strided_slice %43 {offsets = [0, 128], sizes = [8, 128], strides = [1, 1]} : vector<8x384xf32> to vector<8x128xf32>
    %58 = arith.addf %57, %47 : vector<8x128xf32>
    %59 = arith.negf %58 : vector<8x128xf32>
    %60 = math.exp %59 : vector<8x128xf32>
    %cst_34 = arith.constant 1.000000e+00 : f32
    %61 = vector.broadcast %cst_34 : f32 to vector<8x128xf32>
    %62 = arith.addf %61, %60 : vector<8x128xf32>
    %63 = arith.divf %61, %62 : vector<8x128xf32>
    %64 = vector.extract_strided_slice %43 {offsets = [0, 256], sizes = [8, 128], strides = [1, 1]} : vector<8x384xf32> to vector<8x128xf32>
    %65 = arith.addf %49, %10 : vector<8x128xf32>
    %66 = arith.mulf %56, %65 : vector<8x128xf32>
    %67 = arith.addf %64, %66 : vector<8x128xf32>
    %68 = math.tanh %67 : vector<8x128xf32>
    %cst_35 = arith.constant 1.000000e+00 : f32
    %69 = vector.broadcast %cst_35 : f32 to vector<8x128xf32>
    %70 = arith.subf %69, %63 : vector<8x128xf32>
    %71 = arith.mulf %70, %68 : vector<8x128xf32>
    %72 = arith.mulf %63, %42 : vector<8x128xf32>
    %73 = arith.addf %71, %72 : vector<8x128xf32>
    %c16 = arith.constant 16 : index
    %c0_36 = arith.constant 0 : index
    %74 = vector.load %arg11[%c16, %c0_36] : memref<64x384xf32, #tpu.memory_space<vmem>>, vector<8x384xf32>
    %c0_37 = arith.constant 0 : index
    %c0_38 = arith.constant 0 : index
    %75 = vector.load %arg3[%c0_37, %c0_38] : memref<128x384xf32, #tpu.memory_space<vmem>>, vector<128x128xf32>
    %cst_39 = arith.constant dense<0.000000e+00> : vector<8x128xf32>
    %76 = tpu.matmul %73, %75, %cst_39 {dimension_numbers = #tpu.dot_dimension_numbers<[1], [0], [0], [1], [0, 0, 1, 1], [], []>} : vector<8x128xf32>, vector<128x128xf32>, vector<8x128xf32> -> vector<8x128xf32>
    %c0_40 = arith.constant 0 : index
    %c128_41 = arith.constant 128 : index
    %77 = vector.load %arg3[%c0_40, %c128_41] : memref<128x384xf32, #tpu.memory_space<vmem>>, vector<128x128xf32>
    %cst_42 = arith.constant dense<0.000000e+00> : vector<8x128xf32>
    %78 = tpu.matmul %73, %77, %cst_42 {dimension_numbers = #tpu.dot_dimension_numbers<[1], [0], [0], [1], [0, 0, 1, 1], [], []>} : vector<8x128xf32>, vector<128x128xf32>, vector<8x128xf32> -> vector<8x128xf32>
    %c0_43 = arith.constant 0 : index
    %c256_44 = arith.constant 256 : index
    %79 = vector.load %arg3[%c0_43, %c256_44] : memref<128x384xf32, #tpu.memory_space<vmem>>, vector<128x128xf32>
    %cst_45 = arith.constant dense<0.000000e+00> : vector<8x128xf32>
    %80 = tpu.matmul %73, %79, %cst_45 {dimension_numbers = #tpu.dot_dimension_numbers<[1], [0], [0], [1], [0, 0, 1, 1], [], []>} : vector<8x128xf32>, vector<128x128xf32>, vector<8x128xf32> -> vector<8x128xf32>
    %81 = vector.extract_strided_slice %74 {offsets = [0, 0], sizes = [8, 128], strides = [1, 1]} : vector<8x384xf32> to vector<8x128xf32>
    %82 = arith.addf %81, %76 : vector<8x128xf32>
    %83 = arith.negf %82 : vector<8x128xf32>
    %84 = math.exp %83 : vector<8x128xf32>
    %cst_46 = arith.constant 1.000000e+00 : f32
    %85 = vector.broadcast %cst_46 : f32 to vector<8x128xf32>
    %86 = arith.addf %85, %84 : vector<8x128xf32>
    %87 = arith.divf %85, %86 : vector<8x128xf32>
    %88 = vector.extract_strided_slice %74 {offsets = [0, 128], sizes = [8, 128], strides = [1, 1]} : vector<8x384xf32> to vector<8x128xf32>
    %89 = arith.addf %88, %78 : vector<8x128xf32>
    %90 = arith.negf %89 : vector<8x128xf32>
    %91 = math.exp %90 : vector<8x128xf32>
    %cst_47 = arith.constant 1.000000e+00 : f32
    %92 = vector.broadcast %cst_47 : f32 to vector<8x128xf32>
    %93 = arith.addf %92, %91 : vector<8x128xf32>
    %94 = arith.divf %92, %93 : vector<8x128xf32>
    %95 = vector.extract_strided_slice %74 {offsets = [0, 256], sizes = [8, 128], strides = [1, 1]} : vector<8x384xf32> to vector<8x128xf32>
    %96 = arith.addf %80, %10 : vector<8x128xf32>
    %97 = arith.mulf %87, %96 : vector<8x128xf32>
    %98 = arith.addf %95, %97 : vector<8x128xf32>
    %99 = math.tanh %98 : vector<8x128xf32>
    %cst_48 = arith.constant 1.000000e+00 : f32
    %100 = vector.broadcast %cst_48 : f32 to vector<8x128xf32>
    %101 = arith.subf %100, %94 : vector<8x128xf32>
    %102 = arith.mulf %101, %99 : vector<8x128xf32>
    %103 = arith.mulf %94, %73 : vector<8x128xf32>
    %104 = arith.addf %102, %103 : vector<8x128xf32>
    %c24 = arith.constant 24 : index
    %c0_49 = arith.constant 0 : index
    %105 = vector.load %arg11[%c24, %c0_49] : memref<64x384xf32, #tpu.memory_space<vmem>>, vector<8x384xf32>
    %c0_50 = arith.constant 0 : index
    %c0_51 = arith.constant 0 : index
    %106 = vector.load %arg3[%c0_50, %c0_51] : memref<128x384xf32, #tpu.memory_space<vmem>>, vector<128x128xf32>
    %cst_52 = arith.constant dense<0.000000e+00> : vector<8x128xf32>
    %107 = tpu.matmul %104, %106, %cst_52 {dimension_numbers = #tpu.dot_dimension_numbers<[1], [0], [0], [1], [0, 0, 1, 1], [], []>} : vector<8x128xf32>, vector<128x128xf32>, vector<8x128xf32> -> vector<8x128xf32>
    %c0_53 = arith.constant 0 : index
    %c128_54 = arith.constant 128 : index
    %108 = vector.load %arg3[%c0_53, %c128_54] : memref<128x384xf32, #tpu.memory_space<vmem>>, vector<128x128xf32>
    %cst_55 = arith.constant dense<0.000000e+00> : vector<8x128xf32>
    %109 = tpu.matmul %104, %108, %cst_55 {dimension_numbers = #tpu.dot_dimension_numbers<[1], [0], [0], [1], [0, 0, 1, 1], [], []>} : vector<8x128xf32>, vector<128x128xf32>, vector<8x128xf32> -> vector<8x128xf32>
    %c0_56 = arith.constant 0 : index
    %c256_57 = arith.constant 256 : index
    %110 = vector.load %arg3[%c0_56, %c256_57] : memref<128x384xf32, #tpu.memory_space<vmem>>, vector<128x128xf32>
    %cst_58 = arith.constant dense<0.000000e+00> : vector<8x128xf32>
    %111 = tpu.matmul %104, %110, %cst_58 {dimension_numbers = #tpu.dot_dimension_numbers<[1], [0], [0], [1], [0, 0, 1, 1], [], []>} : vector<8x128xf32>, vector<128x128xf32>, vector<8x128xf32> -> vector<8x128xf32>
    %112 = vector.extract_strided_slice %105 {offsets = [0, 0], sizes = [8, 128], strides = [1, 1]} : vector<8x384xf32> to vector<8x128xf32>
    %113 = arith.addf %112, %107 : vector<8x128xf32>
    %114 = arith.negf %113 : vector<8x128xf32>
    %115 = math.exp %114 : vector<8x128xf32>
    %cst_59 = arith.constant 1.000000e+00 : f32
    %116 = vector.broadcast %cst_59 : f32 to vector<8x128xf32>
    %117 = arith.addf %116, %115 : vector<8x128xf32>
    %118 = arith.divf %116, %117 : vector<8x128xf32>
    %119 = vector.extract_strided_slice %105 {offsets = [0, 128], sizes = [8, 128], strides = [1, 1]} : vector<8x384xf32> to vector<8x128xf32>
    %120 = arith.addf %119, %109 : vector<8x128xf32>
    %121 = arith.negf %120 : vector<8x128xf32>
    %122 = math.exp %121 : vector<8x128xf32>
    %cst_60 = arith.constant 1.000000e+00 : f32
    %123 = vector.broadcast %cst_60 : f32 to vector<8x128xf32>
    %124 = arith.addf %123, %122 : vector<8x128xf32>
    %125 = arith.divf %123, %124 : vector<8x128xf32>
    %126 = vector.extract_strided_slice %105 {offsets = [0, 256], sizes = [8, 128], strides = [1, 1]} : vector<8x384xf32> to vector<8x128xf32>
    %127 = arith.addf %111, %10 : vector<8x128xf32>
    %128 = arith.mulf %118, %127 : vector<8x128xf32>
    %129 = arith.addf %126, %128 : vector<8x128xf32>
    %130 = math.tanh %129 : vector<8x128xf32>
    %cst_61 = arith.constant 1.000000e+00 : f32
    %131 = vector.broadcast %cst_61 : f32 to vector<8x128xf32>
    %132 = arith.subf %131, %125 : vector<8x128xf32>
    %133 = arith.mulf %132, %130 : vector<8x128xf32>
    %134 = arith.mulf %125, %104 : vector<8x128xf32>
    %135 = arith.addf %133, %134 : vector<8x128xf32>
    %c32 = arith.constant 32 : index
    %c0_62 = arith.constant 0 : index
    %136 = vector.load %arg11[%c32, %c0_62] : memref<64x384xf32, #tpu.memory_space<vmem>>, vector<8x384xf32>
    %c0_63 = arith.constant 0 : index
    %c0_64 = arith.constant 0 : index
    %137 = vector.load %arg3[%c0_63, %c0_64] : memref<128x384xf32, #tpu.memory_space<vmem>>, vector<128x128xf32>
    %cst_65 = arith.constant dense<0.000000e+00> : vector<8x128xf32>
    %138 = tpu.matmul %135, %137, %cst_65 {dimension_numbers = #tpu.dot_dimension_numbers<[1], [0], [0], [1], [0, 0, 1, 1], [], []>} : vector<8x128xf32>, vector<128x128xf32>, vector<8x128xf32> -> vector<8x128xf32>
    %c0_66 = arith.constant 0 : index
    %c128_67 = arith.constant 128 : index
    %139 = vector.load %arg3[%c0_66, %c128_67] : memref<128x384xf32, #tpu.memory_space<vmem>>, vector<128x128xf32>
    %cst_68 = arith.constant dense<0.000000e+00> : vector<8x128xf32>
    %140 = tpu.matmul %135, %139, %cst_68 {dimension_numbers = #tpu.dot_dimension_numbers<[1], [0], [0], [1], [0, 0, 1, 1], [], []>} : vector<8x128xf32>, vector<128x128xf32>, vector<8x128xf32> -> vector<8x128xf32>
    %c0_69 = arith.constant 0 : index
    %c256_70 = arith.constant 256 : index
    %141 = vector.load %arg3[%c0_69, %c256_70] : memref<128x384xf32, #tpu.memory_space<vmem>>, vector<128x128xf32>
    %cst_71 = arith.constant dense<0.000000e+00> : vector<8x128xf32>
    %142 = tpu.matmul %135, %141, %cst_71 {dimension_numbers = #tpu.dot_dimension_numbers<[1], [0], [0], [1], [0, 0, 1, 1], [], []>} : vector<8x128xf32>, vector<128x128xf32>, vector<8x128xf32> -> vector<8x128xf32>
    %143 = vector.extract_strided_slice %136 {offsets = [0, 0], sizes = [8, 128], strides = [1, 1]} : vector<8x384xf32> to vector<8x128xf32>
    %144 = arith.addf %143, %138 : vector<8x128xf32>
    %145 = arith.negf %144 : vector<8x128xf32>
    %146 = math.exp %145 : vector<8x128xf32>
    %cst_72 = arith.constant 1.000000e+00 : f32
    %147 = vector.broadcast %cst_72 : f32 to vector<8x128xf32>
    %148 = arith.addf %147, %146 : vector<8x128xf32>
    %149 = arith.divf %147, %148 : vector<8x128xf32>
    %150 = vector.extract_strided_slice %136 {offsets = [0, 128], sizes = [8, 128], strides = [1, 1]} : vector<8x384xf32> to vector<8x128xf32>
    %151 = arith.addf %150, %140 : vector<8x128xf32>
    %152 = arith.negf %151 : vector<8x128xf32>
    %153 = math.exp %152 : vector<8x128xf32>
    %cst_73 = arith.constant 1.000000e+00 : f32
    %154 = vector.broadcast %cst_73 : f32 to vector<8x128xf32>
    %155 = arith.addf %154, %153 : vector<8x128xf32>
    %156 = arith.divf %154, %155 : vector<8x128xf32>
    %157 = vector.extract_strided_slice %136 {offsets = [0, 256], sizes = [8, 128], strides = [1, 1]} : vector<8x384xf32> to vector<8x128xf32>
    %158 = arith.addf %142, %10 : vector<8x128xf32>
    %159 = arith.mulf %149, %158 : vector<8x128xf32>
    %160 = arith.addf %157, %159 : vector<8x128xf32>
    %161 = math.tanh %160 : vector<8x128xf32>
    %cst_74 = arith.constant 1.000000e+00 : f32
    %162 = vector.broadcast %cst_74 : f32 to vector<8x128xf32>
    %163 = arith.subf %162, %156 : vector<8x128xf32>
    %164 = arith.mulf %163, %161 : vector<8x128xf32>
    %165 = arith.mulf %156, %135 : vector<8x128xf32>
    %166 = arith.addf %164, %165 : vector<8x128xf32>
    %c40 = arith.constant 40 : index
    %c0_75 = arith.constant 0 : index
    %167 = vector.load %arg11[%c40, %c0_75] : memref<64x384xf32, #tpu.memory_space<vmem>>, vector<8x384xf32>
    %c0_76 = arith.constant 0 : index
    %c0_77 = arith.constant 0 : index
    %168 = vector.load %arg3[%c0_76, %c0_77] : memref<128x384xf32, #tpu.memory_space<vmem>>, vector<128x128xf32>
    %cst_78 = arith.constant dense<0.000000e+00> : vector<8x128xf32>
    %169 = tpu.matmul %166, %168, %cst_78 {dimension_numbers = #tpu.dot_dimension_numbers<[1], [0], [0], [1], [0, 0, 1, 1], [], []>} : vector<8x128xf32>, vector<128x128xf32>, vector<8x128xf32> -> vector<8x128xf32>
    %c0_79 = arith.constant 0 : index
    %c128_80 = arith.constant 128 : index
    %170 = vector.load %arg3[%c0_79, %c128_80] : memref<128x384xf32, #tpu.memory_space<vmem>>, vector<128x128xf32>
    %cst_81 = arith.constant dense<0.000000e+00> : vector<8x128xf32>
    %171 = tpu.matmul %166, %170, %cst_81 {dimension_numbers = #tpu.dot_dimension_numbers<[1], [0], [0], [1], [0, 0, 1, 1], [], []>} : vector<8x128xf32>, vector<128x128xf32>, vector<8x128xf32> -> vector<8x128xf32>
    %c0_82 = arith.constant 0 : index
    %c256_83 = arith.constant 256 : index
    %172 = vector.load %arg3[%c0_82, %c256_83] : memref<128x384xf32, #tpu.memory_space<vmem>>, vector<128x128xf32>
    %cst_84 = arith.constant dense<0.000000e+00> : vector<8x128xf32>
    %173 = tpu.matmul %166, %172, %cst_84 {dimension_numbers = #tpu.dot_dimension_numbers<[1], [0], [0], [1], [0, 0, 1, 1], [], []>} : vector<8x128xf32>, vector<128x128xf32>, vector<8x128xf32> -> vector<8x128xf32>
    %174 = vector.extract_strided_slice %167 {offsets = [0, 0], sizes = [8, 128], strides = [1, 1]} : vector<8x384xf32> to vector<8x128xf32>
    %175 = arith.addf %174, %169 : vector<8x128xf32>
    %176 = arith.negf %175 : vector<8x128xf32>
    %177 = math.exp %176 : vector<8x128xf32>
    %cst_85 = arith.constant 1.000000e+00 : f32
    %178 = vector.broadcast %cst_85 : f32 to vector<8x128xf32>
    %179 = arith.addf %178, %177 : vector<8x128xf32>
    %180 = arith.divf %178, %179 : vector<8x128xf32>
    %181 = vector.extract_strided_slice %167 {offsets = [0, 128], sizes = [8, 128], strides = [1, 1]} : vector<8x384xf32> to vector<8x128xf32>
    %182 = arith.addf %181, %171 : vector<8x128xf32>
    %183 = arith.negf %182 : vector<8x128xf32>
    %184 = math.exp %183 : vector<8x128xf32>
    %cst_86 = arith.constant 1.000000e+00 : f32
    %185 = vector.broadcast %cst_86 : f32 to vector<8x128xf32>
    %186 = arith.addf %185, %184 : vector<8x128xf32>
    %187 = arith.divf %185, %186 : vector<8x128xf32>
    %188 = vector.extract_strided_slice %167 {offsets = [0, 256], sizes = [8, 128], strides = [1, 1]} : vector<8x384xf32> to vector<8x128xf32>
    %189 = arith.addf %173, %10 : vector<8x128xf32>
    %190 = arith.mulf %180, %189 : vector<8x128xf32>
    %191 = arith.addf %188, %190 : vector<8x128xf32>
    %192 = math.tanh %191 : vector<8x128xf32>
    %cst_87 = arith.constant 1.000000e+00 : f32
    %193 = vector.broadcast %cst_87 : f32 to vector<8x128xf32>
    %194 = arith.subf %193, %187 : vector<8x128xf32>
    %195 = arith.mulf %194, %192 : vector<8x128xf32>
    %196 = arith.mulf %187, %166 : vector<8x128xf32>
    %197 = arith.addf %195, %196 : vector<8x128xf32>
    %c48 = arith.constant 48 : index
    %c0_88 = arith.constant 0 : index
    %198 = vector.load %arg11[%c48, %c0_88] : memref<64x384xf32, #tpu.memory_space<vmem>>, vector<8x384xf32>
    %c0_89 = arith.constant 0 : index
    %c0_90 = arith.constant 0 : index
    %199 = vector.load %arg3[%c0_89, %c0_90] : memref<128x384xf32, #tpu.memory_space<vmem>>, vector<128x128xf32>
    %cst_91 = arith.constant dense<0.000000e+00> : vector<8x128xf32>
    %200 = tpu.matmul %197, %199, %cst_91 {dimension_numbers = #tpu.dot_dimension_numbers<[1], [0], [0], [1], [0, 0, 1, 1], [], []>} : vector<8x128xf32>, vector<128x128xf32>, vector<8x128xf32> -> vector<8x128xf32>
    %c0_92 = arith.constant 0 : index
    %c128_93 = arith.constant 128 : index
    %201 = vector.load %arg3[%c0_92, %c128_93] : memref<128x384xf32, #tpu.memory_space<vmem>>, vector<128x128xf32>
    %cst_94 = arith.constant dense<0.000000e+00> : vector<8x128xf32>
    %202 = tpu.matmul %197, %201, %cst_94 {dimension_numbers = #tpu.dot_dimension_numbers<[1], [0], [0], [1], [0, 0, 1, 1], [], []>} : vector<8x128xf32>, vector<128x128xf32>, vector<8x128xf32> -> vector<8x128xf32>
    %c0_95 = arith.constant 0 : index
    %c256_96 = arith.constant 256 : index
    %203 = vector.load %arg3[%c0_95, %c256_96] : memref<128x384xf32, #tpu.memory_space<vmem>>, vector<128x128xf32>
    %cst_97 = arith.constant dense<0.000000e+00> : vector<8x128xf32>
    %204 = tpu.matmul %197, %203, %cst_97 {dimension_numbers = #tpu.dot_dimension_numbers<[1], [0], [0], [1], [0, 0, 1, 1], [], []>} : vector<8x128xf32>, vector<128x128xf32>, vector<8x128xf32> -> vector<8x128xf32>
    %205 = vector.extract_strided_slice %198 {offsets = [0, 0], sizes = [8, 128], strides = [1, 1]} : vector<8x384xf32> to vector<8x128xf32>
    %206 = arith.addf %205, %200 : vector<8x128xf32>
    %207 = arith.negf %206 : vector<8x128xf32>
    %208 = math.exp %207 : vector<8x128xf32>
    %cst_98 = arith.constant 1.000000e+00 : f32
    %209 = vector.broadcast %cst_98 : f32 to vector<8x128xf32>
    %210 = arith.addf %209, %208 : vector<8x128xf32>
    %211 = arith.divf %209, %210 : vector<8x128xf32>
    %212 = vector.extract_strided_slice %198 {offsets = [0, 128], sizes = [8, 128], strides = [1, 1]} : vector<8x384xf32> to vector<8x128xf32>
    %213 = arith.addf %212, %202 : vector<8x128xf32>
    %214 = arith.negf %213 : vector<8x128xf32>
    %215 = math.exp %214 : vector<8x128xf32>
    %cst_99 = arith.constant 1.000000e+00 : f32
    %216 = vector.broadcast %cst_99 : f32 to vector<8x128xf32>
    %217 = arith.addf %216, %215 : vector<8x128xf32>
    %218 = arith.divf %216, %217 : vector<8x128xf32>
    %219 = vector.extract_strided_slice %198 {offsets = [0, 256], sizes = [8, 128], strides = [1, 1]} : vector<8x384xf32> to vector<8x128xf32>
    %220 = arith.addf %204, %10 : vector<8x128xf32>
    %221 = arith.mulf %211, %220 : vector<8x128xf32>
    %222 = arith.addf %219, %221 : vector<8x128xf32>
    %223 = math.tanh %222 : vector<8x128xf32>
    %cst_100 = arith.constant 1.000000e+00 : f32
    %224 = vector.broadcast %cst_100 : f32 to vector<8x128xf32>
    %225 = arith.subf %224, %218 : vector<8x128xf32>
    %226 = arith.mulf %225, %223 : vector<8x128xf32>
    %227 = arith.mulf %218, %197 : vector<8x128xf32>
    %228 = arith.addf %226, %227 : vector<8x128xf32>
    %c56 = arith.constant 56 : index
    %c0_101 = arith.constant 0 : index
    %229 = vector.load %arg11[%c56, %c0_101] : memref<64x384xf32, #tpu.memory_space<vmem>>, vector<8x384xf32>
    %c0_102 = arith.constant 0 : index
    %c0_103 = arith.constant 0 : index
    %230 = vector.load %arg3[%c0_102, %c0_103] : memref<128x384xf32, #tpu.memory_space<vmem>>, vector<128x128xf32>
    %cst_104 = arith.constant dense<0.000000e+00> : vector<8x128xf32>
    %231 = tpu.matmul %228, %230, %cst_104 {dimension_numbers = #tpu.dot_dimension_numbers<[1], [0], [0], [1], [0, 0, 1, 1], [], []>} : vector<8x128xf32>, vector<128x128xf32>, vector<8x128xf32> -> vector<8x128xf32>
    %c0_105 = arith.constant 0 : index
    %c128_106 = arith.constant 128 : index
    %232 = vector.load %arg3[%c0_105, %c128_106] : memref<128x384xf32, #tpu.memory_space<vmem>>, vector<128x128xf32>
    %cst_107 = arith.constant dense<0.000000e+00> : vector<8x128xf32>
    %233 = tpu.matmul %228, %232, %cst_107 {dimension_numbers = #tpu.dot_dimension_numbers<[1], [0], [0], [1], [0, 0, 1, 1], [], []>} : vector<8x128xf32>, vector<128x128xf32>, vector<8x128xf32> -> vector<8x128xf32>
    %c0_108 = arith.constant 0 : index
    %c256_109 = arith.constant 256 : index
    %234 = vector.load %arg3[%c0_108, %c256_109] : memref<128x384xf32, #tpu.memory_space<vmem>>, vector<128x128xf32>
    %cst_110 = arith.constant dense<0.000000e+00> : vector<8x128xf32>
    %235 = tpu.matmul %228, %234, %cst_110 {dimension_numbers = #tpu.dot_dimension_numbers<[1], [0], [0], [1], [0, 0, 1, 1], [], []>} : vector<8x128xf32>, vector<128x128xf32>, vector<8x128xf32> -> vector<8x128xf32>
    %236 = vector.extract_strided_slice %229 {offsets = [0, 0], sizes = [8, 128], strides = [1, 1]} : vector<8x384xf32> to vector<8x128xf32>
    %237 = arith.addf %236, %231 : vector<8x128xf32>
    %238 = arith.negf %237 : vector<8x128xf32>
    %239 = math.exp %238 : vector<8x128xf32>
    %cst_111 = arith.constant 1.000000e+00 : f32
    %240 = vector.broadcast %cst_111 : f32 to vector<8x128xf32>
    %241 = arith.addf %240, %239 : vector<8x128xf32>
    %242 = arith.divf %240, %241 : vector<8x128xf32>
    %243 = vector.extract_strided_slice %229 {offsets = [0, 128], sizes = [8, 128], strides = [1, 1]} : vector<8x384xf32> to vector<8x128xf32>
    %244 = arith.addf %243, %233 : vector<8x128xf32>
    %245 = arith.negf %244 : vector<8x128xf32>
    %246 = math.exp %245 : vector<8x128xf32>
    %cst_112 = arith.constant 1.000000e+00 : f32
    %247 = vector.broadcast %cst_112 : f32 to vector<8x128xf32>
    %248 = arith.addf %247, %246 : vector<8x128xf32>
    %249 = arith.divf %247, %248 : vector<8x128xf32>
    %250 = vector.extract_strided_slice %229 {offsets = [0, 256], sizes = [8, 128], strides = [1, 1]} : vector<8x384xf32> to vector<8x128xf32>
    %251 = arith.addf %235, %10 : vector<8x128xf32>
    %252 = arith.mulf %242, %251 : vector<8x128xf32>
    %253 = arith.addf %250, %252 : vector<8x128xf32>
    %254 = math.tanh %253 : vector<8x128xf32>
    %cst_113 = arith.constant 1.000000e+00 : f32
    %255 = vector.broadcast %cst_113 : f32 to vector<8x128xf32>
    %256 = arith.subf %255, %249 : vector<8x128xf32>
    %257 = arith.mulf %256, %254 : vector<8x128xf32>
    %258 = arith.mulf %249, %228 : vector<8x128xf32>
    %259 = arith.addf %257, %258 : vector<8x128xf32>
    %c0_114 = arith.constant 0 : index
    %c0_115 = arith.constant 0 : index
    %260 = vector.load %arg6[%c0_114, %c0_115] : memref<128x128xf32, #tpu.memory_space<vmem>>, vector<128x128xf32>
    %cst_116 = arith.constant dense<0.000000e+00> : vector<8x128xf32>
    %261 = tpu.matmul %259, %260, %cst_116 {dimension_numbers = #tpu.dot_dimension_numbers<[1], [0], [0], [1], [0, 0, 1, 1], [], []>} : vector<8x128xf32>, vector<128x128xf32>, vector<8x128xf32> -> vector<8x128xf32>
    %c0_117 = arith.constant 0 : index
    %c0_118 = arith.constant 0 : index
    %262 = vector.load %arg7[%c0_117, %c0_118] : memref<1x128xf32, #tpu.memory_space<vmem>>, vector<1x128xf32>
    %263 = vector.broadcast %262 : vector<1x128xf32> to vector<8x128xf32>
    %264 = arith.addf %261, %263 : vector<8x128xf32>
    %cst_119 = arith.constant 0.000000e+00 : f32
    %265 = vector.broadcast %cst_119 : f32 to vector<8x128xf32>
    %266 = arith.maximumf %264, %265 : vector<8x128xf32>
    %c0_120 = arith.constant 0 : index
    %c0_121 = arith.constant 0 : index
    %267 = vector.load %arg8[%c0_120, %c0_121] : memref<128x128xf32, #tpu.memory_space<vmem>>, vector<128x128xf32>
    %cst_122 = arith.constant dense<0.000000e+00> : vector<8x128xf32>
    %268 = tpu.matmul %266, %267, %cst_122 {dimension_numbers = #tpu.dot_dimension_numbers<[1], [0], [0], [1], [0, 0, 1, 1], [], []>} : vector<8x128xf32>, vector<128x128xf32>, vector<8x128xf32> -> vector<8x128xf32>
    %c0_123 = arith.constant 0 : index
    %c0_124 = arith.constant 0 : index
    %269 = vector.load %arg9[%c0_123, %c0_124] : memref<1x128xf32, #tpu.memory_space<vmem>>, vector<1x128xf32>
    %270 = vector.broadcast %269 : vector<1x128xf32> to vector<8x128xf32>
    %271 = arith.addf %268, %270 : vector<8x128xf32>
    %c0_125 = arith.constant 0 : index
    %c0_126 = arith.constant 0 : index
    %c0_127 = arith.constant 0 : index
    %272 = vector.load %arg10[%c0_125, %c0_126, %c0_127] : memref<1x8x128xf32, #tpu.memory_space<vmem>>, vector<1x8x128xf32>
    %273 = vector.shape_cast %272 : vector<1x8x128xf32> to vector<8x128xf32>
    %274 = vector.shape_cast %271 : vector<8x128xf32> to vector<1x8x128xf32>
    tpu.vector_store %arg10[%c0_125, %c0_126, %c0_127], %274 {strides = array<i32>} : memref<1x8x128xf32, #tpu.memory_space<vmem>>, vector<1x8x128xf32>,
    return
  }
  func.func @transform_0(%arg0: i32) -> (i32, i32, i32) {
    %c0_i32 = arith.constant 0 : i32
    %c0_i32_0 = arith.constant 0 : i32
    %c0_i32_1 = arith.constant 0 : i32
    return %arg0, %c0_i32, %c0_i32_0 : i32, i32, i32
  }
  func.func @transform_1(%arg0: i32) -> (i32, i32) {
    %c0_i32 = arith.constant 0 : i32
    %c0_i32_0 = arith.constant 0 : i32
    %c0_i32_1 = arith.constant 0 : i32
    return %c0_i32, %c0_i32_0 : i32, i32
  }
  func.func @transform_2(%arg0: i32) -> (i32, i32) {
    %c0_i32 = arith.constant 0 : i32
    %c0_i32_0 = arith.constant 0 : i32
    %c0_i32_1 = arith.constant 0 : i32
    return %c0_i32, %c0_i32_0 : i32, i32
  }
  func.func @transform_3(%arg0: i32) -> (i32, i32) {
    %c0_i32 = arith.constant 0 : i32
    %c0_i32_0 = arith.constant 0 : i32
    %c0_i32_1 = arith.constant 0 : i32
    return %c0_i32, %c0_i32_0 : i32, i32
  }
  func.func @transform_4(%arg0: i32) -> (i32, i32) {
    %c0_i32 = arith.constant 0 : i32
    %c0_i32_0 = arith.constant 0 : i32
    %c0_i32_1 = arith.constant 0 : i32
    return %c0_i32, %c0_i32_0 : i32, i32
  }
  func.func @transform_5(%arg0: i32) -> (i32, i32) {
    %c0_i32 = arith.constant 0 : i32
    %c0_i32_0 = arith.constant 0 : i32
    %c0_i32_1 = arith.constant 0 : i32
    return %c0_i32, %c0_i32_0 : i32, i32
  }
  func.func @transform_6(%arg0: i32) -> (i32, i32) {
    %c0_i32 = arith.constant 0 : i32
    %c0_i32_0 = arith.constant 0 : i32
    %c0_i32_1 = arith.constant 0 : i32
    return %c0_i32, %c0_i32_0 : i32, i32
  }
  func.func @transform_7(%arg0: i32) -> (i32, i32) {
    %c0_i32 = arith.constant 0 : i32
    %c0_i32_0 = arith.constant 0 : i32
    %c0_i32_1 = arith.constant 0 : i32
    return %c0_i32, %c0_i32_0 : i32, i32
  }
  func.func @transform_8(%arg0: i32) -> (i32, i32) {
    %c0_i32 = arith.constant 0 : i32
    %c0_i32_0 = arith.constant 0 : i32
    %c0_i32_1 = arith.constant 0 : i32
    return %c0_i32, %c0_i32_0 : i32, i32
  }
  func.func @transform_9(%arg0: i32) -> (i32, i32, i32) {
    %c0_i32 = arith.constant 0 : i32
    %c0_i32_0 = arith.constant 0 : i32
    %c0_i32_1 = arith.constant 0 : i32
    return %arg0, %c0_i32, %c0_i32_0 : i32, i32, i32
  }
}

</mosaic_0001>

<bundles_post_ra>
// kernel: multi_head_gru_forward.1
= control target key start
LH: loop header
LB: loop body
LE: loop exit
PB: predicated region body
PF: predicated region fallthrough
CT: control target
= control target key end

     0   :  { %14 = vsyncpa [#allocation4], 0  ;;  %s5498_s0 = inlined_call_operand.vmem [shape: f32[1,64,4], index: 0, kind: input, shape index: {}]   ;;  %s5499_s1 = inlined_call_operand.vmem [shape: f32[4,384], index: 1, kind: input, shape index: {}]   ;;  %s5500_s2 = inlined_call_operand.hbm [shape: f32[128,384], index: 2, kind: input, shape index: {}]   ;;  %s5501_s3 = inlined_call_operand.vmem [shape: f32[1,384], index: 3, kind: input, shape index: {}]   ;;  %s5502_s4 = inlined_call_operand.vmem [shape: f32[1,128], index: 4, kind: input, shape index: {}]   ;;  %s5503_s5 = inlined_call_operand.vmem [shape: f32[128,128], index: 5, kind: input, shape index: {}]   ;;  %s5504_s6 = inlined_call_operand.vmem [shape: f32[1,128], index: 6, kind: input, shape index: {}]   ;;  %s5505_s7 = inlined_call_operand.hbm [shape: f32[128,128], index: 7, kind: input, shape index: {}]   ;;  %s5506_s8 = inlined_call_operand.vmem [shape: f32[1,128], index: 8, kind: input, shape index: {}]   ;;  %s5507_s9 = inlined_call_operand.vmem [shape: f32[1,8,128], index: 9, kind: output, shape index: {}]  }
   0x1   :  { %15 = vsyncpa [#allocation6], 0  ;;  %s4661_s30 = smov [#allocation3]   ;;  %s4613_s13 = scalar_lea.hbm %s5500_s2, 6144 }
   0x2   :  { %s25_s10 = sshll.u32 %s4661_s30, 4  ;;  %p4614_p0 = scmp.ne.s32.totalorder %s5500_s2, %s4613_s13  ;;  %s26_s10 = int_to_ptr.vmem [resolvable:$true] %s25_s10 }
   0x3   :  { %p4617_p1 = scmp.lt.u32.totalorder %s4613_s13, %s5500_s2 }
   0x5   :  { %p4619_p2 = pnand %p4617_p1, %p4614_p0 }
   0x7   :  { %4622 = shalt.err (!%p4619_p2)
}
   0x8   :  { %s4623_s18 = scalar_lea.vmem %s26_s10, 6144  ;;  %p4628_p4 = scmp.lt.s32.totalorder %s26_s10, %s26_s10 }
   0x9   :  { %p4624_p3 = scmp.ne.s32.totalorder %s26_s10, %s4623_s18  ;;  %p4629_p5 = scmp.lt.s32.totalorder %s4623_s18, %s4623_s18 }
   0xb   :  { %p4630_p6 = por %p4629_p5, %p4628_p4 }
   0xd   :  { %p4631_p7 = pnand %p4630_p6, %p4624_p3 }
   0xf   :  { %4634 = shalt.err (!%p4631_p7)
}
  0x10   :  { %s4662_s19 = smov 384   ;;  %s4663_s20 = smov 24  }
  0x11   :  { %31 = dma.hbm_to_vmem [thread:$0]  %s5500_s2, 6144, %s26_s10, [#allocation4], %s4662_s19, %s4662_s19, %s4663_s20  }
  0x12   :  { %s4664_s23 = smov [#allocation5]   ;;  %s4635_s27 = scalar_lea.hbm %s5505_s7, 2048 }
  0x13   :  { %s45_s24 = sshll.u32 %s4664_s23, 4  ;;  %p4636_p8 = scmp.ne.s32.totalorder %s5505_s7, %s4635_s27  ;;  %s46_s24 = int_to_ptr.vmem [resolvable:$true] %s45_s24 }
  0x14   :  { %p4639_p9 = scmp.lt.u32.totalorder %s4635_s27, %s5505_s7 }
  0x16   :  { %p4641_p10 = pnand %p4639_p9, %p4636_p8 }
  0x18   :  { %4644 = shalt.err (!%p4641_p10)
}
  0x19   :  { %s4645_s12 = scalar_lea.vmem %s46_s24, 2048  ;;  %p4650_p12 = scmp.lt.s32.totalorder %s46_s24, %s46_s24 }
  0x1a   :  { %p4646_p11 = scmp.ne.s32.totalorder %s46_s24, %s4645_s12  ;;  %p4651_p13 = scmp.lt.s32.totalorder %s4645_s12, %s4645_s12 }
  0x1c   :  { %p4652_p0 = por %p4651_p13, %p4650_p12 }
  0x1e   :  { %p4653_p1 = pnand %p4652_p0, %p4646_p11 }
  0x20   :  { %4656 = shalt.err (!%p4653_p1)
}
  0x21   :  { %s4665_s2 = smov 128   ;;  %s4666_s10 = smov 8  }
  0x22   :  { %51 = dma.hbm_to_vmem [thread:$0]  %s5505_s7, 2048, %s46_s24, [#allocation6], %s4665_s2, %s4665_s2, %s4666_s10  }
  0x23   :  { %4657 = dma.done.wait [#allocation4], 6144  }
  0x24   :  { %4658 = vsyncadd [#allocation4], 4294961152 }
  0x25   :  { %4659 = dma.done.wait [#allocation6], 2048  }
  0x26   :  { %4660 = vsyncadd [#allocation6], 4294965248  ;;  %v5510_v0 = vmov 0.0   ;;  %vm115_vm0 = vcmask 1043456   ;;  %vm90_vm1 = vcmask 31744   ;;  %v68_v2 = vld [vmem:[%s5499_s1] sm:$0xff] }
  0x27   :  { %186 = vmatprep.mubr.f32.mxu0 %v5510_v0  ;;  %v69_v1 = vld [vmem:[%s5499_s1 + $0x8] sm:$0xf]  ;;  %v60_v3 = vld [vmem:[%s5498_s0] sm:$0xff]  ;;  %v89_v4 = vcombine.high %v68_v2, %v68_v2  ;;  %v375_v10 = vld [vmem:[#allocation3 + $0x18] sm:$0xff]  ;;  %v5508_v12 = vmov 0.0|0.0   ;;  %vm4669_vm2 = vmmov 0  }
  0x28   :  { %2974 = vmatprep.subr.msk.mxu1 %vm115_vm0, %v69_v1  ;;  %2976 = vmatprep.mubr.msk.f32.mxu1 %vm90_vm1, %v60_v3  ;;  %v61_v5 = vld [vmem:[%s5498_s0 + $0x8] sm:$0xff]  ;;  %v461_v7 = vld [vmem:[#allocation3 + $0x20] sm:$0xff]  ;;  %v462_v11 = vld [vmem:[#allocation3 + $0x38] sm:$0xff] }
  0x29   :  { %v460_v6 = vld [vmem:[#allocation3 + $0x8] sm:$0xff]  ;;  %2975 = vmatpush3.msk.msra.mxu1 %vm115_vm0, %v69_v1  ;;  %v374_v9 = vld [vmem:[#allocation3] sm:$0xff]  ;;  %2485 = vmatprep.subr.msk.mxu0 %vm115_vm0, %v89_v4  ;;  %v463_v14 = vld [vmem:[#allocation3 + $0x50] sm:$0xff] }
  0x2a   :  { %v4760_v8 = vpack.c.bf16 %v461_v7, %v460_v6  ;;  %3922 = vmatprep.subr.bf16.mxu1 %v5508_v12  ;;  %v4764_v13 = vpack.c.bf16 %v375_v10, %v374_v9  ;;  %2486 = vmatpush1.msk.msra.mxu0 %vm115_vm0, %v68_v2  ;;  %v376_v15 = vld [vmem:[#allocation3 + $0x30] sm:$0xff]  ;;  %v377_v16 = vld [vmem:[#allocation3 + $0x48] sm:$0xff]  ;;  %v4770_v17 = vpack.c.bf16 %v463_v14, %v462_v11  ;;  %v465_v19 = vld [vmem:[#allocation3 + $0x80] sm:$0xff] }
  0x2b   :  { %2977 = vmatmul.mubr.msk.f32.vlgmr.msra.gmra.mrb[0].mxu1 %vm90_vm1, %v61_v5  ;;  %2487 = vmatmul.mubr.msk.f32.vlgmr.msra.gmra.mrb[0].mxu0 %vm90_vm1, %v60_v3  ;;  %v464_v18 = vld [vmem:[#allocation3 + $0x68] sm:$0xff]  ;;  %v4776_v20 = vpack.c.bf16 %v377_v16, %v376_v15  ;;  %v62_v21 = vld [vmem:[%s5498_s0 + $0x10] sm:$0xff]  ;;  %v378_v22 = vld [vmem:[#allocation3 + $0x60] sm:$0xff] }
  0x2c   :  { %3924 = vmatpush3.bf16.msra.mxu1 %v4760_v8  ;;  %3898 = vmatprep.subr.bf16.mxu0 %v5508_v12  ;;  %v379_v23 = vld [vmem:[#allocation3 + $0x78] sm:$0xff]  ;;  %v4785_v24 = vpack.c.bf16 %v465_v19, %v464_v18  ;;  %v467_v26 = vld [vmem:[#allocation3 + $0xb0] sm:$0xff]  ;;  %v64_v29 = vld [vmem:[%s5498_s0 + $0x20] sm:$0xff] }
  0x2d   :  { %3925 = vmatprep.subr.bf16.mxu1 %v5508_v12  ;;  %3900 = vmatpush3.bf16.msra.mxu0 %v4764_v13  ;;  %v466_v25 = vld [vmem:[#allocation3 + $0x98] sm:$0xff]  ;;  %v4793_v28 = vpack.c.bf16 %v379_v23, %v378_v22  ;;  %v380_v30 = vld [vmem:[#allocation3 + $0x90] sm:$0xff]  ;;  %v381_v31 = vld [vmem:[#allocation3 + $0xa8] sm:$0xff] }
  0x2e   :  { %192 = vmatprep.mubr.f32.mxu0 %v5510_v0  ;;  %3901 = vmatprep.subr.bf16.mxu0 %v5508_v12  ;;  %v63_v27 = vld [vmem:[%s5498_s0 + $0x18] sm:$0xff]  ;;  %v4803_v32 = vpack.c.bf16 %v467_v26, %v466_v25  ;;  %v66_v33 = vld [vmem:[%s5498_s0 + $0x30] sm:$0xff]  ;;  %v468_v34 = vld [vmem:[#allocation3 + $0xc8] sm:$0xff]  ;;  %v4814_v37 = vpack.c.bf16 %v381_v31, %v380_v30 }
  0x2f   :  { %2979 = vmatprep.mubr.msk.f32.mxu1 %vm90_vm1, %v62_v21  ;;  %2488 = vmatmul.mubr.msk.f32.gmra.mrb[2].mxu0 %vm90_vm1, %v61_v5  ;;  %v469_v35 = vld [vmem:[#allocation3 + $0xe0] sm:$0xff]  ;;  %v65_v36 = vld [vmem:[%s5498_s0 + $0x28] sm:$0xff]  ;;  %v383_v39 = vld [vmem:[#allocation3 + $0xd8] sm:$0xff] }
  0x30   :  { %3927 = vmatpush3.bf16.msra.mxu1 %v4770_v17  ;;  %198 = vmatprep.mubr.f32.mxu0 %v5510_v0  ;;  %v382_v38 = vld [vmem:[#allocation3 + $0xc0] sm:$0xff]  ;;  %v67_v40 = vld [vmem:[%s5498_s0 + $0x38] sm:$0xff]  ;;  %v4824_v41 = vpack.c.bf16 %v469_v35, %v468_v34  ;;  %v471_v43 = vld [vmem:[#allocation3 + $0x110] sm:$0xff] }
  0x31   :  { %3928 = vmatprep.subr.bf16.mxu1 %v5508_v12  ;;  %3903 = vmatpush3.bf16.msra.mxu0 %v4776_v20  ;;  %v470_v42 = vld [vmem:[#allocation3 + $0xf8] sm:$0xff]  ;;  %v4829_v44 = vpack.c.bf16 %v383_v39, %v382_v38  ;;  %v384_v45 = vld [vmem:[#allocation3 + $0xf0] sm:$0xff]  ;;  %v385_v46 = vld [vmem:[#allocation3 + $0x108] sm:$0xff] }
  0x32   :  { %2980 = vmatmul.mubr.msk.f32.gmra.mrb[2].mxu1 %vm90_vm1, %v63_v27  ;;  %3904 = vmatprep.subr.bf16.mxu0 %v5508_v12  ;;  %v4837_v47 = vpack.c.bf16 %v471_v43, %v470_v42  ;;  %v472_v48 = vld [vmem:[#allocation3 + $0x128] sm:$0xff]  ;;  %v473_v49 = vld [vmem:[#allocation3 + $0x140] sm:$0xff]  ;;  %v4842_v50 = vpack.c.bf16 %v385_v46, %v384_v45  ;;  %v387_v52 = vld [vmem:[#allocation3 + $0x138] sm:$0xff] }
  0x33   :  { %2982 = vmatprep.mubr.msk.f32.mxu1 %vm90_vm1, %v64_v29  ;;  %2489 = vmatmul.mubr.msk.f32.gmra.mrb[4].mxu0 %vm90_vm1, %v62_v21  ;;  %v386_v51 = vld [vmem:[#allocation3 + $0x120] sm:$0xff]  ;;  %v4847_v53 = vpack.c.bf16 %v473_v49, %v472_v48  ;;  %v474_v54 = vld [vmem:[#allocation3 + $0x158] sm:$0xff]  ;;  %v475_v55 = vld [vmem:[#allocation3 + $0x170] sm:$0xff] }
  0x34   :  { %3930 = vmatpush3.bf16.msra.mxu1 %v4785_v24  ;;  %204 = vmatprep.mubr.f32.mxu0 %v5510_v0  ;;  %v4852_v56 = vpack.c.bf16 %v387_v52, %v386_v51  ;;  %v388_v57 = vld [vmem:[#allocation3 + $0x150] sm:$0xff]  ;;  %v389_v58 = vld [vmem:[#allocation3 + $0x168] sm:$0xff]  ;;  %v4857_v59 = vpack.c.bf16 %v475_v55, %v474_v54  ;;  %v548_v1 = vld [vmem:[#allocation3 + $0x40] sm:$0xff] }
  0x35   :  { %3931 = vmatprep.subr.bf16.mxu1 %v5508_v12  ;;  %3906 = vmatpush3.bf16.msra.mxu0 %v4793_v28  ;;  %v4862_v60 = vpack.c.bf16 %v389_v58, %v388_v57  ;;  %v546_v61 = vld [vmem:[#allocation3 + $0x10] sm:$0xff]  ;;  %v547_v62 = vld [vmem:[#allocation3 + $0x28] sm:$0xff]  ;;  %v549_v2 = vld [vmem:[#allocation3 + $0x58] sm:$0xff] }
  0x36   :  { %2983 = vmatmul.mubr.msk.f32.gmra.mrb[4].mxu1 %vm90_vm1, %v65_v36  ;;  %3907 = vmatprep.subr.bf16.mxu0 %v5508_v12  ;;  %v4871_v63 = vpack.c.bf16 %v547_v62, %v546_v61  ;;  %v4881_v3 = vpack.c.bf16 %v549_v2, %v548_v1  ;;  %v550_v4 = vld [vmem:[#allocation3 + $0x70] sm:$0xff]  ;;  %v551_v5 = vld [vmem:[#allocation3 + $0x88] sm:$0xff]  ;;  %v552_v7 = vld [vmem:[#allocation3 + $0xa0] sm:$0xff] }
  0x37   :  { %2985 = vmatprep.mubr.msk.f32.mxu1 %vm90_vm1, %v66_v33  ;;  %2490 = vmatmul.mubr.msk.f32.gmra.mrb[6].mxu0 %vm90_vm1, %v63_v27  ;;  %v4889_v6 = vpack.c.bf16 %v551_v5, %v550_v4  ;;  %v553_v9 = vld [vmem:[#allocation3 + $0xb8] sm:$0xff]  ;;  %v554_v11 = vld [vmem:[#allocation3 + $0xd0] sm:$0xff]  ;;  %v555_v14 = vld [vmem:[#allocation3 + $0xe8] sm:$0xff] }
  0x38   :  { %3933 = vmatpush3.bf16.msra.mxu1 %v4803_v32  ;;  %210 = vmatprep.mubr.f32.mxu0 %v5510_v0  ;;  %v4895_v10 = vpack.c.bf16 %v553_v9, %v552_v7  ;;  %v4901_v15 = vpack.c.bf16 %v555_v14, %v554_v11  ;;  %v556_v16 = vld [vmem:[#allocation3 + $0x100] sm:$0xff]  ;;  %v557_v18 = vld [vmem:[#allocation3 + $0x118] sm:$0xff]  ;;  %v558_v21 = vld [vmem:[#allocation3 + $0x130] sm:$0xff] }
  0x39   :  { %3934 = vmatprep.subr.bf16.mxu1 %v5508_v12  ;;  %3909 = vmatpush3.bf16.msra.mxu0 %v4814_v37  ;;  %v4907_v19 = vpack.c.bf16 %v557_v18, %v556_v16  ;;  %v559_v22 = vld [vmem:[#allocation3 + $0x148] sm:$0xff]  ;;  %v560_v25 = vld [vmem:[#allocation3 + $0x160] sm:$0xff]  ;;  %v561_v26 = vld [vmem:[#allocation3 + $0x178] sm:$0xff] }
  0x3a   :  { %2986 = vmatmul.mubr.msk.f32.gmra.mrb[6].mxu1 %vm90_vm1, %v67_v40  ;;  %3910 = vmatprep.subr.bf16.mxu0 %v5508_v12  ;;  %v4913_v23 = vpack.c.bf16 %v559_v22, %v558_v21  ;;  %v4919_v27 = vpack.c.bf16 %v561_v26, %v560_v25 }
  0x3b   :  { %3055 = vmatprep.mubr.msk.f32.mxu1 %vm4669_vm2, %v5510_v0  ;;  %2491 = vmatmul.mubr.msk.f32.gmra.mrb[8].mxu0 %vm90_vm1, %v64_v29  ;;  %v72_v29 = vlaneseq }
  0x3c   :  { %3936 = vmatpush3.bf16.msra.mxu1 %v4824_v41  ;;  %216 = vmatprep.mubr.f32.mxu0 %v5510_v0 }
  0x3d   :  { %3937 = vmatprep.subr.bf16.mxu1 %v5508_v12  ;;  %3912 = vmatpush3.bf16.msra.mxu0 %v4829_v44  ;;  %v73_v30 = vshrl.u32 %v72_v29, 7 }
  0x3e   :  { %3913 = vmatprep.subr.bf16.mxu0 %v5508_v12 }
  0x3f   :  { %2492 = vmatmul.mubr.msk.f32.gmra.mrb[10].mxu0 %vm90_vm1, %v65_v36  ;;  %v82_v31 = vsub.s32 2, %v73_v30  ;;  %v74_v35 = vsub.s32 0, %v73_v30  ;;  %v78_v39 = vsub.s32 1, %v73_v30 }
  0x40   :  { %3939 = vmatpush3.bf16.msra.mxu1 %v4837_v47  ;;  %222 = vmatprep.mubr.f32.mxu0 %v5510_v0 }
  0x41   :  { %3940 = vmatprep.subr.bf16.mxu1 %v5508_v12  ;;  %3915 = vmatpush3.bf16.msra.mxu0 %v4842_v50 }
  0x42   :  { %3916 = vmatprep.subr.bf16.mxu0 %v5508_v12 }
  0x43   :  { %2493 = vmatmul.mubr.msk.f32.gmra.mrb[12].mxu0 %vm90_vm1, %v66_v33  ;;  %v70_v33 = vld [vmem:[%s5501_s3] sm:$0x7] }
  0x44   :  { %3942 = vmatpush3.bf16.msra.mxu1 %v4847_v53  ;;  %228 = vmatprep.mubr.f32.mxu0 %v5510_v0  ;;  %v4948_v34 = vrot.slane %v70_v33, %v82_v31  ;;  %v75_v45 = vrot.slane %v70_v33, %v74_v35  ;;  %v79_v46 = vrot.slane %v70_v33, %v78_v39 }
  0x45   :  { %3943 = vmatprep.subr.bf16.mxu1 %v5508_v12  ;;  %3918 = vmatpush3.bf16.msra.mxu0 %v4852_v56 }
  0x46   :  { %3919 = vmatprep.subr.bf16.mxu0 %v5508_v12 }
  0x47   :  { %2494 = vmatmul.mubr.msk.f32.gmra.mrb[14].mxu0 %vm90_vm1, %v67_v40 }
  0x48   :  { %3945 = vmatpush3.bf16.msra.mxu1 %v4857_v59  ;;  %3020 = vmatprep.mubr.msk.f32.mxu0 %vm4669_vm2, %v5510_v0 }
  0x49   :  { %3970 = vmatprep.subr.bf16.mxu1 %v5508_v12  ;;  %3921 = vmatpush3.bf16.msra.mxu0 %v4862_v60 }
  0x4a   :  { %3946 = vmatprep.subr.bf16.mxu0 %v5508_v12 }
  0x4b   :  { %3056 = vmatmul.mubr.f32.vlgmr.msra.gmra.mrb[8].mxu1 %v5510_v0 }
  0x4c   :  { %3972 = vmatpush3.bf16.msra.mxu1 %v4764_v13  ;;  %3125 = vmatprep.mubr.msk.f32.mxu1 %vm4669_vm2, %v5510_v0 }
  0x4d   :  { %3021 = vmatmul.mubr.f32.vlgmr.msra.gmra.mrb[16].mxu0 %v5510_v0  ;;  %3973 = vmatprep.subr.bf16.mxu1 %v5508_v12 }
  0x4e   :  { %3948 = vmatpush3.bf16.msra.mxu0 %v4871_v63  ;;  %3090 = vmatprep.mubr.msk.f32.mxu0 %vm4669_vm2, %v5510_v0 }
  0x4f   :  { %3949 = vmatprep.subr.bf16.mxu0 %v5508_v12 }
  0x50   :  { %3975 = vmatpush3.bf16.msra.mxu1 %v4776_v20 }
  0x51   :  { %3976 = vmatprep.subr.bf16.mxu1 %v5508_v12 }
  0x52   :  { %3951 = vmatpush3.bf16.msra.mxu0 %v4881_v3 }
  0x53   :  { %3952 = vmatprep.subr.bf16.mxu0 %v5508_v12 }
  0x54   :  { %3978 = vmatpush3.bf16.msra.mxu1 %v4793_v28 }
  0x55   :  { %3979 = vmatprep.subr.bf16.mxu1 %v5508_v12 }
  0x56   :  { %3954 = vmatpush3.bf16.msra.mxu0 %v4889_v6 }
  0x57   :  { %3955 = vmatprep.subr.bf16.mxu0 %v5508_v12 }
  0x58   :  { %3981 = vmatpush3.bf16.msra.mxu1 %v4814_v37 }
  0x59   :  { %3982 = vmatprep.subr.bf16.mxu1 %v5508_v12 }
  0x5a   :  { %3957 = vmatpush3.bf16.msra.mxu0 %v4895_v10 }
  0x5b   :  { %3958 = vmatprep.subr.bf16.mxu0 %v5508_v12 }
  0x5c   :  { %3984 = vmatpush3.bf16.msra.mxu1 %v4829_v44 }
  0x5d   :  { %3985 = vmatprep.subr.bf16.mxu1 %v5508_v12 }
  0x5e   :  { %3960 = vmatpush3.bf16.msra.mxu0 %v4901_v15 }
  0x5f   :  { %3961 = vmatprep.subr.bf16.mxu0 %v5508_v12 }
  0x60   :  { %3987 = vmatpush3.bf16.msra.mxu1 %v4842_v50 }
  0x61   :  { %3988 = vmatprep.subr.bf16.mxu1 %v5508_v12 }
  0x62   :  { %3963 = vmatpush3.bf16.msra.mxu0 %v4907_v19 }
  0x63   :  { %3964 = vmatprep.subr.bf16.mxu0 %v5508_v12 }
  0x64   :  { %3990 = vmatpush3.bf16.msra.mxu1 %v4852_v56 }
  0x65   :  { %3991 = vmatprep.subr.bf16.mxu1 %v5508_v12 }
  0x66   :  { %3966 = vmatpush3.bf16.msra.mxu0 %v4913_v23 }
  0x67   :  { %3967 = vmatprep.subr.bf16.mxu0 %v5508_v12 }
  0x68   :  { %3993 = vmatpush3.bf16.msra.mxu1 %v4862_v60 }
  0x69   :  { %4018 = vmatprep.subr.bf16.mxu1 %v5508_v12 }
  0x6a   :  { %3969 = vmatpush3.bf16.msra.mxu0 %v4919_v27 }
  0x6b   :  { %3994 = vmatprep.subr.bf16.mxu0 %v5508_v12 }
  0x6d   :  { %3091 = vmatmul.mubr.f32.vlgmr.msra.gmra.mrb[18].mxu0 %v5510_v0 }
  0x6e   :  { %3996 = vmatpush3.bf16.msra.mxu0 %v4760_v8  ;;  %3160 = vmatprep.mubr.msk.f32.mxu0 %vm4669_vm2, %v5510_v0 }
  0x6f   :  { %3997 = vmatprep.subr.bf16.mxu0 %v5508_v12 }
  0x72   :  { %3999 = vmatpush3.bf16.msra.mxu0 %v4770_v17 }
  0x73   :  { %4000 = vmatprep.subr.bf16.mxu0 %v5508_v12 }
  0x76   :  { %4002 = vmatpush3.bf16.msra.mxu0 %v4785_v24 }
  0x77   :  { %4003 = vmatprep.subr.bf16.mxu0 %v5508_v12 }
  0x7a   :  { %4005 = vmatpush3.bf16.msra.mxu0 %v4803_v32 }
  0x7b   :  { %4006 = vmatprep.subr.bf16.mxu0 %v5508_v12 }
  0x7e   :  { %4008 = vmatpush3.bf16.msra.mxu0 %v4824_v41 }
  0x7f   :  { %4009 = vmatprep.subr.bf16.mxu0 %v5508_v12 }
  0x82   :  { %4011 = vmatpush3.bf16.msra.mxu0 %v4837_v47 }
  0x83   :  { %4012 = vmatprep.subr.bf16.mxu0 %v5508_v12 }
  0x86   :  { %4014 = vmatpush3.bf16.msra.mxu0 %v4847_v53 }
  0x87   :  { %4015 = vmatprep.subr.bf16.mxu0 %v5508_v12 }
  0x8a   :  { %4017 = vmatpush3.bf16.msra.mxu0 %v4857_v59 }
  0x8b   :  { %4042 = vmatprep.subr.bf16.mxu0 %v5508_v12 }
  0xfe   :  { %v2978_v36 = vpop.f32.mrb[0].mxu1  ;;  %v188_v38 = vpop.f32.mrb[0].mxu0 }
  0xff   :  { %v4951_v40 = vadd.f32 %v2978_v36, %v4948_v34  ;;  %v4953_v42 = vpop.f32.mrb[1].mxu1  ;;  %v190_v43 = vpop.f32.mrb[1].mxu0 }
 0x102   :  { %v194_v48 = vpop.f32.mrb[2].mxu0 }
 0x103   :  { %v4955_v49 = vadd.f32 %v194_v48, %v75_v45  ;;  %v196_v51 = vpop.f32.mrb[3].mxu0 }
 0x104   :  { %v4957_v52 = vadd.f32 %v196_v51, %v79_v46 }
 0x105   :  { %v2981_v54 = vpop.f32.mrb[2].mxu1 }
 0x106   :  { %v4960_v55 = vadd.f32 %v2981_v54, %v4948_v34  ;;  %v311_v57 = vpop.f32.mrb[3].mxu1  ;;  %v200_v58 = vpop.f32.mrb[4].mxu0 }
 0x107   :  { %v4963_v61 = vadd.f32 %v311_v57, %v4948_v34  ;;  %v4965_v62 = vadd.f32 %v200_v58, %v75_v45  ;;  %v202_v1 = vpop.f32.mrb[5].mxu0 }
 0x108   :  { %v4967_v2 = vadd.f32 %v202_v1, %v79_v46 }
 0x109   :  { %v2984_v4 = vpop.f32.mrb[4].mxu1 }
 0x10a   :  { %v4970_v5 = vadd.f32 %v2984_v4, %v4948_v34  ;;  %v321_v7 = vpop.f32.mrb[5].mxu1  ;;  %v206_v9 = vpop.f32.mrb[6].mxu0 }
 0x10b   :  { %v4973_v11 = vadd.f32 %v321_v7, %v4948_v34  ;;  %v4975_v14 = vadd.f32 %v206_v9, %v75_v45  ;;  %v208_v16 = vpop.f32.mrb[7].mxu0  ;;  %v191_v9 = vadd.f32 %v190_v43, %v79_v46  ;;  %v5004_v43 = vld [vmem:[%s5502_s4] ss:$0 sm:$0xff] }
 0x10c   :  { %v4977_v18 = vadd.f32 %v208_v16, %v79_v46 }
 0x10d   :  { %v2987_v21 = vpop.f32.mrb[6].mxu1 }
 0x10e   :  { %v4980_v22 = vadd.f32 %v2987_v21, %v4948_v34  ;;  %v331_v25 = vpop.f32.mrb[7].mxu1  ;;  %v212_v26 = vpop.f32.mrb[8].mxu0 }
 0x10f   :  { %v4983_v29 = vadd.f32 %v331_v25, %v4948_v34  ;;  %v4985_v30 = vadd.f32 %v212_v26, %v75_v45  ;;  %v214_v31 = vpop.f32.mrb[9].mxu0  ;;  %v189_v25 = vadd.f32 %v188_v38, %v75_v45 }
 0x110   :  { %5512 = vst [vmem:[#allocation9_spill] sm:$0xff] %v4980_v22  ;;  %v4987_v33 = vadd.f32 %v214_v31, %v79_v46 }
 0x112   :  { %v218_v35 = vpop.f32.mrb[10].mxu0 }
 0x113   :  { %v4989_v36 = vadd.f32 %v218_v35, %v75_v45  ;;  %v220_v39 = vpop.f32.mrb[11].mxu0 }
 0x114   :  { %v4991_v48 = vadd.f32 %v220_v39, %v79_v46 }
 0x116   :  { %v224_v51 = vpop.f32.mrb[12].mxu0 }
 0x117   :  { %v4993_v54 = vadd.f32 %v224_v51, %v75_v45  ;;  %v226_v57 = vpop.f32.mrb[13].mxu0 }
 0x118   :  { %v4995_v58 = vadd.f32 %v226_v57, %v79_v46 }
 0x11a   :  { %v230_v1 = vpop.f32.mrb[14].mxu0 }
 0x11b   :  { %v4997_v4 = vadd.f32 %v230_v1, %v75_v45  ;;  %v232_v7 = vpop.f32.mrb[15].mxu0 }
 0x11c   :  { %v4999_v16 = vadd.f32 %v232_v7, %v79_v46 }
 0x11e   :  { %v542_v21 = vpop.f32.mrb[8].mxu1 }
 0x11f   :  { %v569_v26 = vadd.f32 %v542_v21, %v191_v9  ;;  %v3057_v31 = vpop.f32.mrb[9].mxu1 }
 0x120   :  { %v456_v35 = vpop.f32.mrb[16].mxu0 }
 0x121   :  { %v562_v39 = vadd.f32 %v456_v35, %v189_v25  ;;  %v3022_v12 = vpop.f32.mrb[17].mxu0  ;;  %v2506_v51 = vmul.f32 -1.442695, %v569_v26 }
 0x123   :  { %v2505_v0 = vmul.f32 -1.442695, %v562_v39 }
 0x125   :  { %4532 = vpow2.f32 %v2505_v0  ;;  %v302_v0 = vadd.f32 %v4953_v42, %v4948_v34  ;;  %v5514_v34 = vmov 0.0|0.0  }
 0x126   :  { %4534 = vpow2.f32 %v2506_v51  ;;  %v5513_v51 = vmov 0.0  }
 0x12f   :  { %v4533_v22 = vpop.eup %4532 }
 0x130   :  { %v566_v57 = vadd.f32 1.0, %v4533_v22  ;;  %v4535_v1 = vpop.eup %4534 }
 0x131   :  { %v573_v46 = vadd.f32 1.0, %v4535_v1 }
 0x132   :  { %4536 = vrcp.f32 %v566_v57 }
 0x133   :  { %4538 = vrcp.f32 %v573_v46 }
 0x13c   :  { %v4537_v9 = vpop.eup %4536 }
 0x13d   :  { %v4539_v22 = vpop.eup %4538 }
 0x13e   :  { %v649_v25 = vsub.f32 1.0, %v4539_v22  ;;  %v651_v35 = vmul.f32 0.0, %v4539_v22 }
 0x140   :  { %v642_v38 = vpop.f32.mrb[18].mxu0 }
 0x141   :  { %v643_v45 = vadd.f32 %v5004_v43, %v642_v38  ;;  %v3092_v7 = vpop.f32.mrb[19].mxu0 }
 0x143   :  { %v646_v12 = vmul.f32 %v4537_v9, %v643_v45 }
 0x145   :  { %v647_v21 = vadd.f32 %v646_v12, %v302_v0 }
 0x147   :  { %4540 = vtanh.f32 %v647_v21 }
 0x151   :  { %v4541_v26 = vpop.eup %4540 }
 0x152   :  { %v650_v31 = vmul.f32 %v4541_v26, %v649_v25 }
 0x154   :  { %v5009_v39 = vadd.f32 %v651_v35, %v650_v31 }
 0x156   :  { %3126 = vmatmul.mubr.f32.vlgmr.msra.gmra.mrb[10].mxu1 %v5009_v39  ;;  %3161 = vmatmul.mubr.f32.vlgmr.msra.gmra.mrb[20].mxu0 %v5009_v39 }
 0x157   :  { %4020 = vmatpush3.bf16.msra.mxu1 %v4871_v63  ;;  %3195 = vmatprep.mubr.msk.f32.mxu1 %vm4669_vm2, %v5513_v51 }
 0x158   :  { %4021 = vmatprep.subr.bf16.mxu1 %v5514_v34  ;;  %4044 = vmatpush3.bf16.msra.mxu0 %v4764_v13 }
 0x159   :  { %4045 = vmatprep.subr.bf16.mxu0 %v5514_v34  ;;  %3230 = vmatprep.mubr.msk.f32.mxu0 %vm4669_vm2, %v5513_v51 }
 0x15b   :  { %4023 = vmatpush3.bf16.msra.mxu1 %v4881_v3 }
 0x15c   :  { %4024 = vmatprep.subr.bf16.mxu1 %v5514_v34  ;;  %4047 = vmatpush3.bf16.msra.mxu0 %v4776_v20 }
 0x15d   :  { %4048 = vmatprep.subr.bf16.mxu0 %v5514_v34 }
 0x15f   :  { %4026 = vmatpush3.bf16.msra.mxu1 %v4889_v6 }
 0x160   :  { %4027 = vmatprep.subr.bf16.mxu1 %v5514_v34  ;;  %4050 = vmatpush3.bf16.msra.mxu0 %v4793_v28 }
 0x161   :  { %4051 = vmatprep.subr.bf16.mxu0 %v5514_v34 }
 0x163   :  { %4029 = vmatpush3.bf16.msra.mxu1 %v4895_v10 }
 0x164   :  { %4030 = vmatprep.subr.bf16.mxu1 %v5514_v34  ;;  %4053 = vmatpush3.bf16.msra.mxu0 %v4814_v37 }
 0x165   :  { %4054 = vmatprep.subr.bf16.mxu0 %v5514_v34 }
 0x167   :  { %4032 = vmatpush3.bf16.msra.mxu1 %v4901_v15 }
 0x168   :  { %4033 = vmatprep.subr.bf16.mxu1 %v5514_v34  ;;  %4056 = vmatpush3.bf16.msra.mxu0 %v4829_v44 }
 0x169   :  { %4057 = vmatprep.subr.bf16.mxu0 %v5514_v34 }
 0x16b   :  { %4035 = vmatpush3.bf16.msra.mxu1 %v4907_v19 }
 0x16c   :  { %4036 = vmatprep.subr.bf16.mxu1 %v5514_v34  ;;  %4059 = vmatpush3.bf16.msra.mxu0 %v4842_v50 }
 0x16d   :  { %4060 = vmatprep.subr.bf16.mxu0 %v5514_v34 }
 0x16f   :  { %4038 = vmatpush3.bf16.msra.mxu1 %v4913_v23 }
 0x170   :  { %4039 = vmatprep.subr.bf16.mxu1 %v5514_v34  ;;  %4062 = vmatpush3.bf16.msra.mxu0 %v4852_v56 }
 0x171   :  { %4063 = vmatprep.subr.bf16.mxu0 %v5514_v34 }
 0x173   :  { %4041 = vmatpush3.bf16.msra.mxu1 %v4919_v27 }
 0x174   :  { %4066 = vmatprep.subr.bf16.mxu1 %v5514_v34  ;;  %4065 = vmatpush3.bf16.msra.mxu0 %v4862_v60 }
 0x175   :  { %4090 = vmatprep.subr.bf16.mxu0 %v5514_v34 }
 0x176   :  { %3196 = vmatmul.mubr.f32.vlgmr.msra.gmra.mrb[12].mxu1 %v5009_v39 }
 0x177   :  { %4068 = vmatpush3.bf16.msra.mxu1 %v4760_v8  ;;  %3265 = vmatprep.mubr.msk.f32.mxu1 %vm4669_vm2, %v5513_v51 }
 0x178   :  { %4069 = vmatprep.subr.bf16.mxu1 %v5514_v34 }
 0x17b   :  { %4071 = vmatpush3.bf16.msra.mxu1 %v4770_v17 }
 0x17c   :  { %4072 = vmatprep.subr.bf16.mxu1 %v5514_v34 }
 0x17f   :  { %4074 = vmatpush3.bf16.msra.mxu1 %v4785_v24 }
 0x180   :  { %4075 = vmatprep.subr.bf16.mxu1 %v5514_v34 }
 0x183   :  { %4077 = vmatpush3.bf16.msra.mxu1 %v4803_v32 }
 0x184   :  { %4078 = vmatprep.subr.bf16.mxu1 %v5514_v34 }
 0x187   :  { %4080 = vmatpush3.bf16.msra.mxu1 %v4824_v41 }
 0x188   :  { %4081 = vmatprep.subr.bf16.mxu1 %v5514_v34 }
 0x18b   :  { %4083 = vmatpush3.bf16.msra.mxu1 %v4837_v47 }
 0x18c   :  { %4084 = vmatprep.subr.bf16.mxu1 %v5514_v34 }
 0x18f   :  { %4086 = vmatpush3.bf16.msra.mxu1 %v4847_v53 }
 0x190   :  { %4087 = vmatprep.subr.bf16.mxu1 %v5514_v34 }
 0x193   :  { %4089 = vmatpush3.bf16.msra.mxu1 %v4857_v59 }
 0x194   :  { %4114 = vmatprep.subr.bf16.mxu1 %v5514_v34 }
 0x229   :  { %v722_v42 = vpop.f32.mrb[10].mxu1  ;;  %v792_v57 = vpop.f32.mrb[20].mxu0 }
 0x22a   :  { %v796_v1 = vadd.f32 %v722_v42, %v4955_v49  ;;  %v803_v46 = vadd.f32 %v792_v57, %v4957_v52  ;;  %v3127_v38 = vpop.f32.mrb[11].mxu1  ;;  %v3162_v45 = vpop.f32.mrb[21].mxu0 }
 0x22c   :  { %v2507_v7 = vmul.f32 -1.442695, %v796_v1  ;;  %v2508_v9 = vmul.f32 -1.442695, %v803_v46 }
 0x22e   :  { %4542 = vpow2.f32 %v2507_v7 }
 0x22f   :  { %4544 = vpow2.f32 %v2508_v9 }
 0x238   :  { %v4543_v0 = vpop.eup %4542 }
 0x239   :  { %v800_v12 = vadd.f32 1.0, %v4543_v0  ;;  %v4545_v21 = vpop.eup %4544 }
 0x23a   :  { %v807_v22 = vadd.f32 1.0, %v4545_v21 }
 0x23b   :  { %4546 = vrcp.f32 %v800_v12 }
 0x23c   :  { %4548 = vrcp.f32 %v807_v22 }
 0x245   :  { %v4547_v35 = vpop.eup %4546 }
 0x246   :  { %v4549_v42 = vpop.eup %4548 }
 0x247   :  { %v883_v57 = vsub.f32 1.0, %v4549_v42  ;;  %v885_v38 = vmul.f32 %v4549_v42, %v5009_v39 }
 0x249   :  { %v876_v25 = vpop.f32.mrb[12].mxu1 }
 0x24a   :  { %v877_v26 = vadd.f32 %v5004_v43, %v876_v25  ;;  %v3197_v31 = vpop.f32.mrb[13].mxu1 }
 0x24c   :  { %v880_v49 = vmul.f32 %v4547_v35, %v877_v26 }
 0x24e   :  { %v881_v52 = vadd.f32 %v880_v49, %v4951_v40 }
 0x250   :  { %4550 = vtanh.f32 %v881_v52 }
 0x25a   :  { %v4551_v1 = vpop.eup %4550 }
 0x25b   :  { %v884_v46 = vmul.f32 %v4551_v1, %v883_v57 }
 0x25d   :  { %v5073_v45 = vadd.f32 %v885_v38, %v884_v46 }
 0x25f   :  { %3231 = vmatmul.mubr.f32.vlgmr.msra.gmra.mrb[22].mxu0 %v5073_v45  ;;  %3266 = vmatmul.mubr.f32.vlgmr.msra.gmra.mrb[14].mxu1 %v5073_v45 }
 0x260   :  { %4092 = vmatpush3.bf16.msra.mxu0 %v4871_v63  ;;  %3300 = vmatprep.mubr.msk.f32.mxu0 %vm4669_vm2, %v5513_v51 }
 0x261   :  { %4093 = vmatprep.subr.bf16.mxu0 %v5514_v34  ;;  %4116 = vmatpush3.bf16.msra.mxu1 %v4764_v13 }
 0x262   :  { %4117 = vmatprep.subr.bf16.mxu1 %v5514_v34  ;;  %3335 = vmatprep.mubr.msk.f32.mxu1 %vm4669_vm2, %v5513_v51 }
 0x264   :  { %4095 = vmatpush3.bf16.msra.mxu0 %v4881_v3 }
 0x265   :  { %4096 = vmatprep.subr.bf16.mxu0 %v5514_v34  ;;  %4119 = vmatpush3.bf16.msra.mxu1 %v4776_v20 }
 0x266   :  { %4120 = vmatprep.subr.bf16.mxu1 %v5514_v34 }
 0x268   :  { %4098 = vmatpush3.bf16.msra.mxu0 %v4889_v6 }
 0x269   :  { %4099 = vmatprep.subr.bf16.mxu0 %v5514_v34  ;;  %4122 = vmatpush3.bf16.msra.mxu1 %v4793_v28 }
 0x26a   :  { %4123 = vmatprep.subr.bf16.mxu1 %v5514_v34 }
 0x26c   :  { %4101 = vmatpush3.bf16.msra.mxu0 %v4895_v10 }
 0x26d   :  { %4102 = vmatprep.subr.bf16.mxu0 %v5514_v34  ;;  %4125 = vmatpush3.bf16.msra.mxu1 %v4814_v37 }
 0x26e   :  { %4126 = vmatprep.subr.bf16.mxu1 %v5514_v34 }
 0x270   :  { %4104 = vmatpush3.bf16.msra.mxu0 %v4901_v15 }
 0x271   :  { %4105 = vmatprep.subr.bf16.mxu0 %v5514_v34  ;;  %4128 = vmatpush3.bf16.msra.mxu1 %v4829_v44 }
 0x272   :  { %4129 = vmatprep.subr.bf16.mxu1 %v5514_v34 }
 0x274   :  { %4107 = vmatpush3.bf16.msra.mxu0 %v4907_v19 }
 0x275   :  { %4108 = vmatprep.subr.bf16.mxu0 %v5514_v34  ;;  %4131 = vmatpush3.bf16.msra.mxu1 %v4842_v50 }
 0x276   :  { %4132 = vmatprep.subr.bf16.mxu1 %v5514_v34 }
 0x278   :  { %4110 = vmatpush3.bf16.msra.mxu0 %v4913_v23 }
 0x279   :  { %4111 = vmatprep.subr.bf16.mxu0 %v5514_v34  ;;  %4134 = vmatpush3.bf16.msra.mxu1 %v4852_v56 }
 0x27a   :  { %4135 = vmatprep.subr.bf16.mxu1 %v5514_v34 }
 0x27c   :  { %4113 = vmatpush3.bf16.msra.mxu0 %v4919_v27 }
 0x27d   :  { %4138 = vmatprep.subr.bf16.mxu0 %v5514_v34  ;;  %4137 = vmatpush3.bf16.msra.mxu1 %v4862_v60 }
 0x27e   :  { %4162 = vmatprep.subr.bf16.mxu1 %v5514_v34 }
 0x27f   :  { %3301 = vmatmul.mubr.f32.vlgmr.msra.gmra.mrb[24].mxu0 %v5073_v45 }
 0x280   :  { %4140 = vmatpush3.bf16.msra.mxu0 %v4760_v8  ;;  %3370 = vmatprep.mubr.msk.f32.mxu0 %vm4669_vm2, %v5513_v51 }
 0x281   :  { %4141 = vmatprep.subr.bf16.mxu0 %v5514_v34 }
 0x284   :  { %4143 = vmatpush3.bf16.msra.mxu0 %v4770_v17 }
 0x285   :  { %4144 = vmatprep.subr.bf16.mxu0 %v5514_v34 }
 0x288   :  { %4146 = vmatpush3.bf16.msra.mxu0 %v4785_v24 }
 0x289   :  { %4147 = vmatprep.subr.bf16.mxu0 %v5514_v34 }
 0x28c   :  { %4149 = vmatpush3.bf16.msra.mxu0 %v4803_v32 }
 0x28d   :  { %4150 = vmatprep.subr.bf16.mxu0 %v5514_v34 }
 0x290   :  { %4152 = vmatpush3.bf16.msra.mxu0 %v4824_v41 }
 0x291   :  { %4153 = vmatprep.subr.bf16.mxu0 %v5514_v34 }
 0x294   :  { %4155 = vmatpush3.bf16.msra.mxu0 %v4837_v47 }
 0x295   :  { %4156 = vmatprep.subr.bf16.mxu0 %v5514_v34 }
 0x298   :  { %4158 = vmatpush3.bf16.msra.mxu0 %v4847_v53 }
 0x299   :  { %4159 = vmatprep.subr.bf16.mxu0 %v5514_v34 }
 0x29c   :  { %4161 = vmatpush3.bf16.msra.mxu0 %v4857_v59 }
 0x29d   :  { %4186 = vmatprep.subr.bf16.mxu0 %v5514_v34 }
 0x332   :  { %v956_v40 = vpop.f32.mrb[22].mxu0  ;;  %v1026_v39 = vpop.f32.mrb[14].mxu1 }
 0x333   :  { %v1030_v7 = vadd.f32 %v956_v40, %v4965_v62  ;;  %v1037_v9 = vadd.f32 %v1026_v39, %v4967_v2  ;;  %v3232_v0 = vpop.f32.mrb[23].mxu0  ;;  %v3267_v12 = vpop.f32.mrb[15].mxu1 }
 0x335   :  { %v2509_v21 = vmul.f32 -1.442695, %v1030_v7  ;;  %v2510_v22 = vmul.f32 -1.442695, %v1037_v9 }
 0x337   :  { %4552 = vpow2.f32 %v2509_v21 }
 0x338   :  { %4554 = vpow2.f32 %v2510_v22 }
 0x341   :  { %v4553_v25 = vpop.eup %4552 }
 0x342   :  { %v1034_v26 = vadd.f32 1.0, %v4553_v25  ;;  %v4555_v31 = vpop.eup %4554 }
 0x343   :  { %v1041_v35 = vadd.f32 1.0, %v4555_v31 }
 0x344   :  { %4556 = vrcp.f32 %v1034_v26 }
 0x345   :  { %4558 = vrcp.f32 %v1041_v35 }
 0x34e   :  { %v4557_v57 = vpop.eup %4556 }
 0x34f   :  { %v4559_v1 = vpop.eup %4558 }
 0x350   :  { %v1117_v46 = vsub.f32 1.0, %v4559_v1  ;;  %v1119_v39 = vmul.f32 %v4559_v1, %v5073_v45 }
 0x352   :  { %v1110_v49 = vpop.f32.mrb[24].mxu0 }
 0x353   :  { %v1111_v52 = vadd.f32 %v5004_v43, %v1110_v49  ;;  %v3302_v42 = vpop.f32.mrb[25].mxu0 }
 0x355   :  { %v1114_v62 = vmul.f32 %v4557_v57, %v1111_v52 }
 0x357   :  { %v1115_v2 = vadd.f32 %v1114_v62, %v4963_v61 }
 0x359   :  { %4560 = vtanh.f32 %v1115_v2 }
 0x363   :  { %v4561_v38 = vpop.eup %4560 }
 0x364   :  { %v1118_v40 = vmul.f32 %v4561_v38, %v1117_v46 }
 0x366   :  { %v5137_v7 = vadd.f32 %v1119_v39, %v1118_v40 }
 0x368   :  { %3336 = vmatmul.mubr.f32.vlgmr.msra.gmra.mrb[16].mxu1 %v5137_v7  ;;  %3371 = vmatmul.mubr.f32.vlgmr.msra.gmra.mrb[26].mxu0 %v5137_v7 }
 0x369   :  { %4164 = vmatpush3.bf16.msra.mxu1 %v4871_v63  ;;  %3405 = vmatprep.mubr.msk.f32.mxu1 %vm4669_vm2, %v5513_v51 }
 0x36a   :  { %4165 = vmatprep.subr.bf16.mxu1 %v5514_v34  ;;  %4188 = vmatpush3.bf16.msra.mxu0 %v4764_v13 }
 0x36b   :  { %4189 = vmatprep.subr.bf16.mxu0 %v5514_v34  ;;  %3440 = vmatprep.mubr.msk.f32.mxu0 %vm4669_vm2, %v5513_v51 }
 0x36d   :  { %4167 = vmatpush3.bf16.msra.mxu1 %v4881_v3 }
 0x36e   :  { %4168 = vmatprep.subr.bf16.mxu1 %v5514_v34  ;;  %4191 = vmatpush3.bf16.msra.mxu0 %v4776_v20 }
 0x36f   :  { %4192 = vmatprep.subr.bf16.mxu0 %v5514_v34 }
 0x371   :  { %4170 = vmatpush3.bf16.msra.mxu1 %v4889_v6 }
 0x372   :  { %4171 = vmatprep.subr.bf16.mxu1 %v5514_v34  ;;  %4194 = vmatpush3.bf16.msra.mxu0 %v4793_v28 }
 0x373   :  { %4195 = vmatprep.subr.bf16.mxu0 %v5514_v34 }
 0x375   :  { %4173 = vmatpush3.bf16.msra.mxu1 %v4895_v10 }
 0x376   :  { %4174 = vmatprep.subr.bf16.mxu1 %v5514_v34  ;;  %4197 = vmatpush3.bf16.msra.mxu0 %v4814_v37 }
 0x377   :  { %4198 = vmatprep.subr.bf16.mxu0 %v5514_v34 }
 0x379   :  { %4176 = vmatpush3.bf16.msra.mxu1 %v4901_v15 }
 0x37a   :  { %4177 = vmatprep.subr.bf16.mxu1 %v5514_v34  ;;  %4200 = vmatpush3.bf16.msra.mxu0 %v4829_v44 }
 0x37b   :  { %4201 = vmatprep.subr.bf16.mxu0 %v5514_v34 }
 0x37d   :  { %4179 = vmatpush3.bf16.msra.mxu1 %v4907_v19 }
 0x37e   :  { %4180 = vmatprep.subr.bf16.mxu1 %v5514_v34  ;;  %4203 = vmatpush3.bf16.msra.mxu0 %v4842_v50 }
 0x37f   :  { %4204 = vmatprep.subr.bf16.mxu0 %v5514_v34 }
 0x381   :  { %4182 = vmatpush3.bf16.msra.mxu1 %v4913_v23 }
 0x382   :  { %4183 = vmatprep.subr.bf16.mxu1 %v5514_v34  ;;  %4206 = vmatpush3.bf16.msra.mxu0 %v4852_v56 }
 0x383   :  { %4207 = vmatprep.subr.bf16.mxu0 %v5514_v34 }
 0x385   :  { %4185 = vmatpush3.bf16.msra.mxu1 %v4919_v27 }
 0x386   :  { %4210 = vmatprep.subr.bf16.mxu1 %v5514_v34  ;;  %4209 = vmatpush3.bf16.msra.mxu0 %v4862_v60 }
 0x387   :  { %4234 = vmatprep.subr.bf16.mxu0 %v5514_v34 }
 0x388   :  { %3406 = vmatmul.mubr.f32.vlgmr.msra.gmra.mrb[18].mxu1 %v5137_v7 }
 0x389   :  { %4212 = vmatpush3.bf16.msra.mxu1 %v4760_v8  ;;  %3475 = vmatprep.mubr.msk.f32.mxu1 %vm4669_vm2, %v5513_v51 }
 0x38a   :  { %4213 = vmatprep.subr.bf16.mxu1 %v5514_v34 }
 0x38d   :  { %4215 = vmatpush3.bf16.msra.mxu1 %v4770_v17 }
 0x38e   :  { %4216 = vmatprep.subr.bf16.mxu1 %v5514_v34 }
 0x391   :  { %4218 = vmatpush3.bf16.msra.mxu1 %v4785_v24 }
 0x392   :  { %4219 = vmatprep.subr.bf16.mxu1 %v5514_v34 }
 0x395   :  { %4221 = vmatpush3.bf16.msra.mxu1 %v4803_v32 }
 0x396   :  { %4222 = vmatprep.subr.bf16.mxu1 %v5514_v34 }
 0x399   :  { %4224 = vmatpush3.bf16.msra.mxu1 %v4824_v41 }
 0x39a   :  { %4225 = vmatprep.subr.bf16.mxu1 %v5514_v34 }
 0x39d   :  { %4227 = vmatpush3.bf16.msra.mxu1 %v4837_v47 }
 0x39e   :  { %4228 = vmatprep.subr.bf16.mxu1 %v5514_v34 }
 0x3a1   :  { %4230 = vmatpush3.bf16.msra.mxu1 %v4847_v53 }
 0x3a2   :  { %4231 = vmatprep.subr.bf16.mxu1 %v5514_v34 }
 0x3a5   :  { %4233 = vmatpush3.bf16.msra.mxu1 %v4857_v59 }
 0x3a6   :  { %4258 = vmatprep.subr.bf16.mxu1 %v5514_v34 }
 0x43b   :  { %v1190_v61 = vpop.f32.mrb[16].mxu1  ;;  %v1260_v45 = vpop.f32.mrb[26].mxu0 }
 0x43c   :  { %v1264_v9 = vadd.f32 %v1190_v61, %v4975_v14  ;;  %v1271_v0 = vadd.f32 %v1260_v45, %v4977_v18  ;;  %v3337_v12 = vpop.f32.mrb[17].mxu1  ;;  %v3372_v21 = vpop.f32.mrb[27].mxu0 }
 0x43e   :  { %v2511_v22 = vmul.f32 -1.442695, %v1264_v9  ;;  %v2512_v25 = vmul.f32 -1.442695, %v1271_v0 }
 0x440   :  { %4562 = vpow2.f32 %v2511_v22 }
 0x441   :  { %4564 = vpow2.f32 %v2512_v25 }
 0x44a   :  { %v4563_v26 = vpop.eup %4562 }
 0x44b   :  { %v1268_v31 = vadd.f32 1.0, %v4563_v26  ;;  %v4565_v35 = vpop.eup %4564 }
 0x44c   :  { %v1275_v49 = vadd.f32 1.0, %v4565_v35 }
 0x44d   :  { %4566 = vrcp.f32 %v1268_v31 }
 0x44e   :  { %4568 = vrcp.f32 %v1275_v49 }
 0x457   :  { %v4567_v62 = vpop.eup %4566 }
 0x458   :  { %v4569_v2 = vpop.eup %4568 }
 0x459   :  { %v1351_v1 = vsub.f32 1.0, %v4569_v2  ;;  %v1353_v40 = vmul.f32 %v4569_v2, %v5137_v7 }
 0x45b   :  { %v1344_v52 = vpop.f32.mrb[18].mxu1 }
 0x45c   :  { %v1345_v42 = vadd.f32 %v5004_v43, %v1344_v52  ;;  %v3407_v57 = vpop.f32.mrb[19].mxu1 }
 0x45e   :  { %v1348_v14 = vmul.f32 %v4567_v62, %v1345_v42 }
 0x460   :  { %v1349_v18 = vadd.f32 %v1348_v14, %v4960_v55 }
 0x462   :  { %4570 = vtanh.f32 %v1349_v18 }
 0x46c   :  { %v4571_v46 = vpop.eup %4570 }
 0x46d   :  { %v1352_v38 = vmul.f32 %v4571_v46, %v1351_v1 }
 0x46f   :  { %v5201_v39 = vadd.f32 %v1353_v40, %v1352_v38 }
 0x471   :  { %3441 = vmatmul.mubr.f32.vlgmr.msra.gmra.mrb[28].mxu0 %v5201_v39  ;;  %3476 = vmatmul.mubr.f32.vlgmr.msra.gmra.mrb[20].mxu1 %v5201_v39 }
 0x472   :  { %4236 = vmatpush3.bf16.msra.mxu0 %v4871_v63  ;;  %3510 = vmatprep.mubr.msk.f32.mxu0 %vm4669_vm2, %v5513_v51 }
 0x473   :  { %4237 = vmatprep.subr.bf16.mxu0 %v5514_v34  ;;  %4260 = vmatpush3.bf16.msra.mxu1 %v4764_v13 }
 0x474   :  { %4261 = vmatprep.subr.bf16.mxu1 %v5514_v34  ;;  %3545 = vmatprep.mubr.msk.f32.mxu1 %vm4669_vm2, %v5513_v51 }
 0x476   :  { %4239 = vmatpush3.bf16.msra.mxu0 %v4881_v3 }
 0x477   :  { %4240 = vmatprep.subr.bf16.mxu0 %v5514_v34  ;;  %4263 = vmatpush3.bf16.msra.mxu1 %v4776_v20 }
 0x478   :  { %4264 = vmatprep.subr.bf16.mxu1 %v5514_v34 }
 0x47a   :  { %4242 = vmatpush3.bf16.msra.mxu0 %v4889_v6 }
 0x47b   :  { %4243 = vmatprep.subr.bf16.mxu0 %v5514_v34  ;;  %4266 = vmatpush3.bf16.msra.mxu1 %v4793_v28 }
 0x47c   :  { %4267 = vmatprep.subr.bf16.mxu1 %v5514_v34 }
 0x47e   :  { %4245 = vmatpush3.bf16.msra.mxu0 %v4895_v10 }
 0x47f   :  { %4246 = vmatprep.subr.bf16.mxu0 %v5514_v34  ;;  %4269 = vmatpush3.bf16.msra.mxu1 %v4814_v37 }
 0x480   :  { %4270 = vmatprep.subr.bf16.mxu1 %v5514_v34 }
 0x482   :  { %4248 = vmatpush3.bf16.msra.mxu0 %v4901_v15 }
 0x483   :  { %4249 = vmatprep.subr.bf16.mxu0 %v5514_v34  ;;  %4272 = vmatpush3.bf16.msra.mxu1 %v4829_v44 }
 0x484   :  { %4273 = vmatprep.subr.bf16.mxu1 %v5514_v34 }
 0x486   :  { %4251 = vmatpush3.bf16.msra.mxu0 %v4907_v19 }
 0x487   :  { %4252 = vmatprep.subr.bf16.mxu0 %v5514_v34  ;;  %4275 = vmatpush3.bf16.msra.mxu1 %v4842_v50 }
 0x488   :  { %4276 = vmatprep.subr.bf16.mxu1 %v5514_v34 }
 0x48a   :  { %4254 = vmatpush3.bf16.msra.mxu0 %v4913_v23 }
 0x48b   :  { %4255 = vmatprep.subr.bf16.mxu0 %v5514_v34  ;;  %4278 = vmatpush3.bf16.msra.mxu1 %v4852_v56 }
 0x48c   :  { %4279 = vmatprep.subr.bf16.mxu1 %v5514_v34 }
 0x48e   :  { %4257 = vmatpush3.bf16.msra.mxu0 %v4919_v27 }
 0x48f   :  { %4282 = vmatprep.subr.bf16.mxu0 %v5514_v34  ;;  %4281 = vmatpush3.bf16.msra.mxu1 %v4862_v60 }
 0x490   :  { %4306 = vmatprep.subr.bf16.mxu1 %v5514_v34 }
 0x491   :  { %3511 = vmatmul.mubr.f32.vlgmr.msra.gmra.mrb[30].mxu0 %v5201_v39 }
 0x492   :  { %4284 = vmatpush3.bf16.msra.mxu0 %v4760_v8  ;;  %3580 = vmatprep.mubr.msk.f32.mxu0 %vm4669_vm2, %v5513_v51 }
 0x493   :  { %4285 = vmatprep.subr.bf16.mxu0 %v5514_v34 }
 0x496   :  { %4287 = vmatpush3.bf16.msra.mxu0 %v4770_v17 }
 0x497   :  { %4288 = vmatprep.subr.bf16.mxu0 %v5514_v34 }
 0x49a   :  { %4290 = vmatpush3.bf16.msra.mxu0 %v4785_v24 }
 0x49b   :  { %4291 = vmatprep.subr.bf16.mxu0 %v5514_v34 }
 0x49e   :  { %4293 = vmatpush3.bf16.msra.mxu0 %v4803_v32 }
 0x49f   :  { %4294 = vmatprep.subr.bf16.mxu0 %v5514_v34 }
 0x4a2   :  { %4296 = vmatpush3.bf16.msra.mxu0 %v4824_v41 }
 0x4a3   :  { %4297 = vmatprep.subr.bf16.mxu0 %v5514_v34 }
 0x4a6   :  { %4299 = vmatpush3.bf16.msra.mxu0 %v4837_v47 }
 0x4a7   :  { %4300 = vmatprep.subr.bf16.mxu0 %v5514_v34 }
 0x4aa   :  { %4302 = vmatpush3.bf16.msra.mxu0 %v4847_v53 }
 0x4ab   :  { %4303 = vmatprep.subr.bf16.mxu0 %v5514_v34 }
 0x4ae   :  { %4305 = vmatpush3.bf16.msra.mxu0 %v4857_v59 }
 0x4af   :  { %4330 = vmatprep.subr.bf16.mxu0 %v5514_v34 }
 0x544   :  { %v1424_v55 = vpop.f32.mrb[28].mxu0  ;;  %v1494_v7 = vpop.f32.mrb[20].mxu1 }
 0x545   :  { %v1498_v61 = vadd.f32 %v1424_v55, %v4985_v30  ;;  %v1505_v45 = vadd.f32 %v1494_v7, %v4987_v33  ;;  %v3442_v9 = vpop.f32.mrb[29].mxu0  ;;  %v3477_v0 = vpop.f32.mrb[21].mxu1 }
 0x547   :  { %v2513_v12 = vmul.f32 -1.442695, %v1498_v61  ;;  %v2514_v21 = vmul.f32 -1.442695, %v1505_v45 }
 0x549   :  { %4572 = vpow2.f32 %v2513_v12 }
 0x54a   :  { %4574 = vpow2.f32 %v2514_v21 }
 0x553   :  { %v4573_v22 = vpop.eup %4572 }
 0x554   :  { %v1502_v25 = vadd.f32 1.0, %v4573_v22  ;;  %v4575_v26 = vpop.eup %4574 }
 0x555   :  { %v1509_v31 = vadd.f32 1.0, %v4575_v26 }
 0x556   :  { %4576 = vrcp.f32 %v1502_v25 }
 0x557   :  { %4578 = vrcp.f32 %v1509_v31 }
 0x560   :  { %v4577_v42 = vpop.eup %4576 }
 0x561   :  { %v4579_v57 = vpop.eup %4578 }
 0x562   :  { %v1585_v62 = vsub.f32 1.0, %v4579_v57  ;;  %v1587_v2 = vmul.f32 %v4579_v57, %v5201_v39 }
 0x564   :  { %v1578_v35 = vpop.f32.mrb[30].mxu0 }
 0x565   :  { %v1579_v49 = vadd.f32 %v5004_v43, %v1578_v35  ;;  %v3512_v52 = vpop.f32.mrb[31].mxu0 }
 0x567   :  { %v1582_v30 = vmul.f32 %v4577_v42, %v1579_v49 }
 0x569   :  { %v1583_v33 = vadd.f32 %v1582_v30, %v4973_v11 }
 0x56b   :  { %4580 = vtanh.f32 %v1583_v33 }
 0x575   :  { %v4581_v14 = vpop.eup %4580 }
 0x576   :  { %v1586_v18 = vmul.f32 %v4581_v14, %v1585_v62 }
 0x578   :  { %v5265_v1 = vadd.f32 %v1587_v2, %v1586_v18 }
 0x57a   :  { %3546 = vmatmul.mubr.f32.vlgmr.msra.gmra.mrb[22].mxu1 %v5265_v1  ;;  %3581 = vmatmul.mubr.f32.vlgmr.msra.gmra.mrb[32].mxu0 %v5265_v1 }
 0x57b   :  { %4308 = vmatpush3.bf16.msra.mxu1 %v4871_v63  ;;  %3615 = vmatprep.mubr.msk.f32.mxu1 %vm4669_vm2, %v5513_v51 }
 0x57c   :  { %4309 = vmatprep.subr.bf16.mxu1 %v5514_v34  ;;  %4332 = vmatpush3.bf16.msra.mxu0 %v4764_v13 }
 0x57d   :  { %4333 = vmatprep.subr.bf16.mxu0 %v5514_v34  ;;  %3650 = vmatprep.mubr.msk.f32.mxu0 %vm4669_vm2, %v5513_v51 }
 0x57f   :  { %4311 = vmatpush3.bf16.msra.mxu1 %v4881_v3 }
 0x580   :  { %4312 = vmatprep.subr.bf16.mxu1 %v5514_v34  ;;  %4335 = vmatpush3.bf16.msra.mxu0 %v4776_v20 }
 0x581   :  { %4336 = vmatprep.subr.bf16.mxu0 %v5514_v34 }
 0x583   :  { %4314 = vmatpush3.bf16.msra.mxu1 %v4889_v6 }
 0x584   :  { %4315 = vmatprep.subr.bf16.mxu1 %v5514_v34  ;;  %4338 = vmatpush3.bf16.msra.mxu0 %v4793_v28 }
 0x585   :  { %4339 = vmatprep.subr.bf16.mxu0 %v5514_v34 }
 0x587   :  { %4317 = vmatpush3.bf16.msra.mxu1 %v4895_v10 }
 0x588   :  { %4318 = vmatprep.subr.bf16.mxu1 %v5514_v34  ;;  %4341 = vmatpush3.bf16.msra.mxu0 %v4814_v37 }
 0x589   :  { %4342 = vmatprep.subr.bf16.mxu0 %v5514_v34 }
 0x58b   :  { %4320 = vmatpush3.bf16.msra.mxu1 %v4901_v15 }
 0x58c   :  { %4321 = vmatprep.subr.bf16.mxu1 %v5514_v34  ;;  %4344 = vmatpush3.bf16.msra.mxu0 %v4829_v44 }
 0x58d   :  { %4345 = vmatprep.subr.bf16.mxu0 %v5514_v34 }
 0x58f   :  { %4323 = vmatpush3.bf16.msra.mxu1 %v4907_v19 }
 0x590   :  { %4324 = vmatprep.subr.bf16.mxu1 %v5514_v34  ;;  %4347 = vmatpush3.bf16.msra.mxu0 %v4842_v50 }
 0x591   :  { %4348 = vmatprep.subr.bf16.mxu0 %v5514_v34 }
 0x593   :  { %4326 = vmatpush3.bf16.msra.mxu1 %v4913_v23 }
 0x594   :  { %4327 = vmatprep.subr.bf16.mxu1 %v5514_v34  ;;  %4350 = vmatpush3.bf16.msra.mxu0 %v4852_v56 }
 0x595   :  { %4351 = vmatprep.subr.bf16.mxu0 %v5514_v34 }
 0x597   :  { %4329 = vmatpush3.bf16.msra.mxu1 %v4919_v27 }
 0x598   :  { %4354 = vmatprep.subr.bf16.mxu1 %v5514_v34  ;;  %4353 = vmatpush3.bf16.msra.mxu0 %v4862_v60 }
 0x599   :  { %4378 = vmatprep.subr.bf16.mxu0 %v5514_v34 }
 0x59a   :  { %3616 = vmatmul.mubr.f32.vlgmr.msra.gmra.mrb[24].mxu1 %v5265_v1 }
 0x59b   :  { %4356 = vmatpush3.bf16.msra.mxu1 %v4760_v8  ;;  %3685 = vmatprep.mubr.msk.f32.mxu1 %vm4669_vm2, %v5513_v51 }
 0x59c   :  { %4357 = vmatprep.subr.bf16.mxu1 %v5514_v34 }
 0x59f   :  { %4359 = vmatpush3.bf16.msra.mxu1 %v4770_v17 }
 0x5a0   :  { %4360 = vmatprep.subr.bf16.mxu1 %v5514_v34 }
 0x5a3   :  { %4362 = vmatpush3.bf16.msra.mxu1 %v4785_v24 }
 0x5a4   :  { %4363 = vmatprep.subr.bf16.mxu1 %v5514_v34 }
 0x5a7   :  { %4365 = vmatpush3.bf16.msra.mxu1 %v4803_v32 }
 0x5a8   :  { %4366 = vmatprep.subr.bf16.mxu1 %v5514_v34 }
 0x5ab   :  { %4368 = vmatpush3.bf16.msra.mxu1 %v4824_v41 }
 0x5ac   :  { %4369 = vmatprep.subr.bf16.mxu1 %v5514_v34 }
 0x5af   :  { %4371 = vmatpush3.bf16.msra.mxu1 %v4837_v47 }
 0x5b0   :  { %4372 = vmatprep.subr.bf16.mxu1 %v5514_v34 }
 0x5b3   :  { %4374 = vmatpush3.bf16.msra.mxu1 %v4847_v53 }
 0x5b4   :  { %4375 = vmatprep.subr.bf16.mxu1 %v5514_v34 }
 0x5b7   :  { %4377 = vmatpush3.bf16.msra.mxu1 %v4857_v59 }
 0x5b8   :  { %4402 = vmatprep.subr.bf16.mxu1 %v5514_v34 }
 0x64d   :  { %v1658_v11 = vpop.f32.mrb[22].mxu1  ;;  %v1728_v46 = vpop.f32.mrb[32].mxu0 }
 0x64e   :  { %v1732_v38 = vadd.f32 %v1658_v11, %v4989_v36  ;;  %v1739_v40 = vadd.f32 %v1728_v46, %v4991_v48  ;;  %v3547_v39 = vpop.f32.mrb[23].mxu1  ;;  %v3582_v55 = vpop.f32.mrb[33].mxu0  ;;  %v2300_v11 = vld [vmem:[%s5503_s5 + $0x48] sm:$0xff] }
 0x64f   :  { %v2303_v55 = vld [vmem:[%s5503_s5 + $0x60] sm:$0xff] }
 0x650   :  { %v2515_v7 = vmul.f32 -1.442695, %v1732_v38  ;;  %v2516_v61 = vmul.f32 -1.442695, %v1739_v40  ;;  %v2301_v38 = vld [vmem:[%s5503_s5 + $0x50] sm:$0xff]  ;;  %v2302_v40 = vld [vmem:[%s5503_s5 + $0x58] sm:$0xff] }
 0x651   :  { %v4490_v39 = vpack.c.bf16 %v2302_v40, %v2301_v38  ;;  %v2522_v40 = vld [vmem:[%s5506_s8] ss:$0 sm:$0xff] }
 0x652   :  { %4582 = vpow2.f32 %v2515_v7  ;;  %v2304_v7 = vld [vmem:[%s5503_s5 + $0x68] sm:$0xff] }
 0x653   :  { %4584 = vpow2.f32 %v2516_v61  ;;  %v4493_v61 = vpack.c.bf16 %v2304_v7, %v2303_v55 }
 0x65c   :  { %v4583_v45 = vpop.eup %4582 }
 0x65d   :  { %v1736_v9 = vadd.f32 1.0, %v4583_v45  ;;  %v4585_v0 = vpop.eup %4584  ;;  %v2305_v45 = vld [vmem:[%s5503_s5 + $0x70] sm:$0xff] }
 0x65e   :  { %v1743_v12 = vadd.f32 1.0, %v4585_v0 }
 0x65f   :  { %4586 = vrcp.f32 %v1736_v9  ;;  %v2306_v9 = vld [vmem:[%s5503_s5 + $0x78] sm:$0xff] }
 0x660   :  { %4588 = vrcp.f32 %v1743_v12  ;;  %v4496_v0 = vpack.c.bf16 %v2306_v9, %v2305_v45  ;;  %v2385_v12 = vld [vmem:[#allocation5] sm:$0xff] }
 0x669   :  { %v4587_v26 = vpop.eup %4586 }
 0x66a   :  { %v4589_v31 = vpop.eup %4588 }
 0x66b   :  { %v1819_v35 = vsub.f32 1.0, %v4589_v31  ;;  %v1821_v42 = vmul.f32 %v4589_v31, %v5265_v1  ;;  %v2299_v1 = vld [vmem:[%s5503_s5 + $0x40] sm:$0xff]  ;;  %v2390_v31 = vld [vmem:[#allocation5 + $0x28] sm:$0xff] }
 0x66c   :  { %v4487_v46 = vpack.c.bf16 %v2300_v11, %v2299_v1 }
 0x66d   :  { %v1812_v21 = vpop.f32.mrb[24].mxu1 }
 0x66e   :  { %v1813_v22 = vadd.f32 %v5004_v43, %v1812_v21  ;;  %v3617_v25 = vpop.f32.mrb[25].mxu1  ;;  %v2386_v21 = vld [vmem:[#allocation5 + $0x8] sm:$0xff] }
 0x66f   :  { %v4499_v25 = vpack.c.bf16 %v2386_v21, %v2385_v12 }
 0x670   :  { %v1816_v36 = vmul.f32 %v4587_v26, %v1813_v22  ;;  %v2387_v22 = vld [vmem:[#allocation5 + $0x10] sm:$0xff]  ;;  %v2388_v26 = vld [vmem:[#allocation5 + $0x18] sm:$0xff] }
 0x672   :  { %v1817_v48 = vadd.f32 %v1816_v36, %v4970_v5  ;;  %v4502_v36 = vpack.c.bf16 %v2388_v26, %v2387_v22 }
 0x674   :  { %4590 = vtanh.f32 %v1817_v48  ;;  %v2389_v48 = vld [vmem:[#allocation5 + $0x20] sm:$0xff] }
 0x67e   :  { %v4591_v49 = vpop.eup %4590 }
 0x67f   :  { %v1820_v52 = vmul.f32 %v4591_v49, %v1819_v35  ;;  %v4505_v35 = vpack.c.bf16 %v2390_v31, %v2389_v48  ;;  %v2391_v49 = vld [vmem:[#allocation5 + $0x30] sm:$0xff] }
 0x681   :  { %v5329_v30 = vadd.f32 %v1821_v42, %v1820_v52  ;;  %v2392_v52 = vld [vmem:[#allocation5 + $0x38] sm:$0xff] }
 0x682   :  { %v4508_v42 = vpack.c.bf16 %v2392_v52, %v2391_v49 }
 0x683   :  { %3651 = vmatmul.mubr.f32.vlgmr.msra.gmra.mrb[34].mxu0 %v5329_v30  ;;  %3686 = vmatmul.mubr.f32.vlgmr.msra.gmra.mrb[26].mxu1 %v5329_v30 }
 0x684   :  { %4380 = vmatpush3.bf16.msra.mxu0 %v4871_v63  ;;  %3720 = vmatprep.mubr.msk.f32.mxu0 %vm4669_vm2, %v5513_v51 }
 0x685   :  { %4381 = vmatprep.subr.bf16.mxu0 %v5514_v34  ;;  %4404 = vmatpush3.bf16.msra.mxu1 %v4764_v13 }
 0x686   :  { %4405 = vmatprep.subr.bf16.mxu1 %v5514_v34  ;;  %3755 = vmatprep.mubr.msk.f32.mxu1 %vm4669_vm2, %v5513_v51 }
 0x688   :  { %4383 = vmatpush3.bf16.msra.mxu0 %v4881_v3 }
 0x689   :  { %4384 = vmatprep.subr.bf16.mxu0 %v5514_v34  ;;  %4407 = vmatpush3.bf16.msra.mxu1 %v4776_v20 }
 0x68a   :  { %4408 = vmatprep.subr.bf16.mxu1 %v5514_v34 }
 0x68c   :  { %4386 = vmatpush3.bf16.msra.mxu0 %v4889_v6 }
 0x68d   :  { %4387 = vmatprep.subr.bf16.mxu0 %v5514_v34  ;;  %4410 = vmatpush3.bf16.msra.mxu1 %v4793_v28 }
 0x68e   :  { %4411 = vmatprep.subr.bf16.mxu1 %v5514_v34 }
 0x690   :  { %4389 = vmatpush3.bf16.msra.mxu0 %v4895_v10 }
 0x691   :  { %4390 = vmatprep.subr.bf16.mxu0 %v5514_v34  ;;  %4413 = vmatpush3.bf16.msra.mxu1 %v4814_v37 }
 0x692   :  { %4414 = vmatprep.subr.bf16.mxu1 %v5514_v34 }
 0x694   :  { %4392 = vmatpush3.bf16.msra.mxu0 %v4901_v15 }
 0x695   :  { %4393 = vmatprep.subr.bf16.mxu0 %v5514_v34  ;;  %4416 = vmatpush3.bf16.msra.mxu1 %v4829_v44 }
 0x696   :  { %4417 = vmatprep.subr.bf16.mxu1 %v5514_v34 }
 0x698   :  { %4395 = vmatpush3.bf16.msra.mxu0 %v4907_v19 }
 0x699   :  { %4396 = vmatprep.subr.bf16.mxu0 %v5514_v34  ;;  %4419 = vmatpush3.bf16.msra.mxu1 %v4842_v50 }
 0x69a   :  { %4420 = vmatprep.subr.bf16.mxu1 %v5514_v34 }
 0x69c   :  { %4398 = vmatpush3.bf16.msra.mxu0 %v4913_v23 }
 0x69d   :  { %4399 = vmatprep.subr.bf16.mxu0 %v5514_v34  ;;  %4422 = vmatpush3.bf16.msra.mxu1 %v4852_v56 }
 0x69e   :  { %4423 = vmatprep.subr.bf16.mxu1 %v5514_v34 }
 0x6a0   :  { %4401 = vmatpush3.bf16.msra.mxu0 %v4919_v27 }
 0x6a1   :  { %4426 = vmatprep.subr.bf16.mxu0 %v5514_v34  ;;  %4425 = vmatpush3.bf16.msra.mxu1 %v4862_v60 }
 0x6a2   :  { %4450 = vmatprep.subr.bf16.mxu1 %v5514_v34 }
 0x6a3   :  { %3721 = vmatmul.mubr.f32.vlgmr.msra.gmra.mrb[36].mxu0 %v5329_v30 }
 0x6a4   :  { %4428 = vmatpush3.bf16.msra.mxu0 %v4760_v8  ;;  %3790 = vmatprep.mubr.msk.f32.mxu0 %vm4669_vm2, %v5513_v51 }
 0x6a5   :  { %4429 = vmatprep.subr.bf16.mxu0 %v5514_v34 }
 0x6a8   :  { %4431 = vmatpush3.bf16.msra.mxu0 %v4770_v17 }
 0x6a9   :  { %4432 = vmatprep.subr.bf16.mxu0 %v5514_v34 }
 0x6ac   :  { %4434 = vmatpush3.bf16.msra.mxu0 %v4785_v24 }
 0x6ad   :  { %4435 = vmatprep.subr.bf16.mxu0 %v5514_v34 }
 0x6b0   :  { %4437 = vmatpush3.bf16.msra.mxu0 %v4803_v32 }
 0x6b1   :  { %4438 = vmatprep.subr.bf16.mxu0 %v5514_v34 }
 0x6b4   :  { %4440 = vmatpush3.bf16.msra.mxu0 %v4824_v41 }
 0x6b5   :  { %4441 = vmatprep.subr.bf16.mxu0 %v5514_v34 }
 0x6b8   :  { %4443 = vmatpush3.bf16.msra.mxu0 %v4837_v47 }
 0x6b9   :  { %4444 = vmatprep.subr.bf16.mxu0 %v5514_v34 }
 0x6bc   :  { %4446 = vmatpush3.bf16.msra.mxu0 %v4847_v53 }
 0x6bd   :  { %4447 = vmatprep.subr.bf16.mxu0 %v5514_v34 }
 0x6c0   :  { %4449 = vmatpush3.bf16.msra.mxu0 %v4857_v59 }
 0x6c1   :  { %4474 = vmatprep.subr.bf16.mxu0 %v5514_v34 }
 0x756   :  { %v1892_v8 = vpop.f32.mrb[34].mxu0  ;;  %v1962_v13 = vpop.f32.mrb[26].mxu1 }
 0x757   :  { %v1966_v17 = vadd.f32 %v1892_v8, %v4993_v54  ;;  %v1973_v20 = vadd.f32 %v1962_v13, %v4995_v58  ;;  %v3652_v24 = vpop.f32.mrb[35].mxu0  ;;  %v3687_v28 = vpop.f32.mrb[27].mxu1  ;;  %v2394_v8 = vld [vmem:[#allocation5 + $0x48] sm:$0xff] }
 0x758   :  { %v2397_v28 = vld [vmem:[#allocation5 + $0x60] sm:$0xff] }
 0x759   :  { %v2517_v32 = vmul.f32 -1.442695, %v1966_v17  ;;  %v2518_v37 = vmul.f32 -1.442695, %v1973_v20  ;;  %v2395_v17 = vld [vmem:[#allocation5 + $0x50] sm:$0xff]  ;;  %v2396_v20 = vld [vmem:[#allocation5 + $0x58] sm:$0xff] }
 0x75a   :  { %v4514_v24 = vpack.c.bf16 %v2396_v20, %v2395_v17 }
 0x75b   :  { %4592 = vpow2.f32 %v2517_v32  ;;  %v2398_v32 = vld [vmem:[#allocation5 + $0x68] sm:$0xff] }
 0x75c   :  { %4594 = vpow2.f32 %v2518_v37  ;;  %v4517_v37 = vpack.c.bf16 %v2398_v32, %v2397_v28 }
 0x765   :  { %v4593_v41 = vpop.eup %4592 }
 0x766   :  { %v1970_v44 = vadd.f32 1.0, %v4593_v41  ;;  %v4595_v47 = vpop.eup %4594 }
 0x767   :  { %v1977_v50 = vadd.f32 1.0, %v4595_v47 }
 0x768   :  { %4596 = vrcp.f32 %v1970_v44 }
 0x769   :  { %4598 = vrcp.f32 %v1977_v50 }
 0x772   :  { %v4597_v60 = vpop.eup %4596 }
 0x773   :  { %v4599_v58 = vpop.eup %4598 }
 0x774   :  { %v2053_v33 = vsub.f32 1.0, %v4599_v58  ;;  %v2055_v14 = vmul.f32 %v4599_v58, %v5329_v30  ;;  %v2393_v30 = vld [vmem:[#allocation5 + $0x40] sm:$0xff] }
 0x775   :  { %v4511_v13 = vpack.c.bf16 %v2394_v8, %v2393_v30 }
 0x776   :  { %v2046_v53 = vpop.f32.mrb[36].mxu0 }
 0x777   :  { %v2047_v56 = vadd.f32 %v5004_v43, %v2046_v53  ;;  %v3722_v59 = vpop.f32.mrb[37].mxu0  ;;  %v2297_v43 = vld [vmem:[%s5503_s5 + $0x30] sm:$0xff] }
 0x779   :  { %v2050_v5 = vmul.f32 %v4597_v60, %v2047_v56 }
 0x77b   :  { %v2051_v54 = vadd.f32 %v2050_v5, %v4983_v29 }
 0x77d   :  { %4600 = vtanh.f32 %v2051_v54 }
 0x787   :  { %v4601_v57 = vpop.eup %4600 }
 0x788   :  { %v2054_v62 = vmul.f32 %v4601_v57, %v2053_v33 }
 0x78a   :  { %v5393_v18 = vadd.f32 %v2055_v14, %v2054_v62 }
 0x78c   :  { %3756 = vmatmul.mubr.f32.vlgmr.msra.gmra.mrb[28].mxu1 %v5393_v18  ;;  %3791 = vmatmul.mubr.f32.vlgmr.msra.gmra.mrb[38].mxu0 %v5393_v18 }
 0x78d   :  { %4452 = vmatpush3.bf16.msra.mxu1 %v4871_v63  ;;  %3825 = vmatprep.mubr.msk.f32.mxu1 %vm4669_vm2, %v5513_v51  ;;  %v2291_v63 = vld [vmem:[%s5503_s5] sm:$0xff] }
 0x78e   :  { %4453 = vmatprep.subr.bf16.mxu1 %v5514_v34  ;;  %3860 = vmatprep.mubr.msk.f32.mxu0 %vm4669_vm2, %v5513_v51 }
 0x791   :  { %4455 = vmatpush3.bf16.msra.mxu1 %v4881_v3  ;;  %v2292_v3 = vld [vmem:[%s5503_s5 + $0x8] sm:$0xff] }
 0x792   :  { %4456 = vmatprep.subr.bf16.mxu1 %v5514_v34 }
 0x795   :  { %4458 = vmatpush3.bf16.msra.mxu1 %v4889_v6  ;;  %v2293_v6 = vld [vmem:[%s5503_s5 + $0x10] sm:$0xff] }
 0x796   :  { %4459 = vmatprep.subr.bf16.mxu1 %v5514_v34 }
 0x799   :  { %4461 = vmatpush3.bf16.msra.mxu1 %v4895_v10  ;;  %v4475_v10 = vpack.c.bf16 %v2292_v3, %v2291_v63  ;;  %v5515_v63 = vld [vmem:[#allocation9_spill] sm:$0xff] }
 0x79a   :  { %4462 = vmatprep.subr.bf16.mxu1 %v5514_v34 }
 0x79b   :  { %4476 = vmatpush3.bf16.msra.mxu0 %v4475_v10 }
 0x79c   :  { %4477 = vmatprep.subr.bf16.mxu0 %v5514_v34 }
 0x79d   :  { %4464 = vmatpush3.bf16.msra.mxu1 %v4901_v15  ;;  %v2294_v15 = vld [vmem:[%s5503_s5 + $0x18] sm:$0xff] }
 0x79e   :  { %4465 = vmatprep.subr.bf16.mxu1 %v5514_v34 }
 0x7a1   :  { %4467 = vmatpush3.bf16.msra.mxu1 %v4907_v19  ;;  %v4478_v19 = vpack.c.bf16 %v2294_v15, %v2293_v6 }
 0x7a2   :  { %4468 = vmatprep.subr.bf16.mxu1 %v5514_v34 }
 0x7a3   :  { %4479 = vmatpush3.bf16.msra.mxu0 %v4478_v19 }
 0x7a4   :  { %4480 = vmatprep.subr.bf16.mxu0 %v5514_v34 }
 0x7a5   :  { %4470 = vmatpush3.bf16.msra.mxu1 %v4913_v23  ;;  %v2295_v23 = vld [vmem:[%s5503_s5 + $0x20] sm:$0xff] }
 0x7a6   :  { %4471 = vmatprep.subr.bf16.mxu1 %v5514_v34 }
 0x7a9   :  { %4473 = vmatpush3.bf16.msra.mxu1 %v4919_v27  ;;  %v2296_v27 = vld [vmem:[%s5503_s5 + $0x28] sm:$0xff] }
 0x7aa   :  { %4498 = vmatprep.subr.bf16.mxu1 %v5514_v34  ;;  %v4481_v29 = vpack.c.bf16 %v2296_v27, %v2295_v23 }
 0x7ac   :  { %3826 = vmatmul.mubr.f32.vlgmr.msra.gmra.mrb[30].mxu1 %v5393_v18  ;;  %4482 = vmatpush3.bf16.msra.mxu0 %v4481_v29  ;;  %v2399_v29 = vld [vmem:[#allocation5 + $0x70] sm:$0xff] }
 0x7ad   :  { %3895 = vmatprep.mubr.msk.f32.mxu1 %vm4669_vm2, %v5513_v51  ;;  %4483 = vmatprep.subr.bf16.mxu0 %v5514_v34  ;;  %v2298_v51 = vld [vmem:[%s5503_s5 + $0x38] sm:$0xff] }
 0x7ae   :  { %v4484_v2 = vpack.c.bf16 %v2298_v51, %v2297_v43  ;;  %4500 = vmatpush3.bf16.msra.mxu1 %v4499_v25  ;;  %v2400_v43 = vld [vmem:[#allocation5 + $0x78] sm:$0xff] }
 0x7af   :  { %4501 = vmatprep.subr.bf16.mxu1 %v5514_v34  ;;  %v4520_v51 = vpack.c.bf16 %v2400_v43, %v2399_v29 }
 0x7b0   :  { %4485 = vmatpush3.bf16.msra.mxu0 %v4484_v2  ;;  %v2521_v2 = vld [vmem:[%s5504_s6] ss:$0 sm:$0xff] }
 0x7b1   :  { %4486 = vmatprep.subr.bf16.mxu0 %v5514_v34 }
 0x7b2   :  { %4503 = vmatpush3.bf16.msra.mxu1 %v4502_v36 }
 0x7b3   :  { %4504 = vmatprep.subr.bf16.mxu1 %v5514_v34 }
 0x7b4   :  { %4488 = vmatpush3.bf16.msra.mxu0 %v4487_v46 }
 0x7b5   :  { %4489 = vmatprep.subr.bf16.mxu0 %v5514_v34 }
 0x7b6   :  { %4506 = vmatpush3.bf16.msra.mxu1 %v4505_v35 }
 0x7b7   :  { %4507 = vmatprep.subr.bf16.mxu1 %v5514_v34 }
 0x7b8   :  { %4491 = vmatpush3.bf16.msra.mxu0 %v4490_v39 }
 0x7b9   :  { %4492 = vmatprep.subr.bf16.mxu0 %v5514_v34 }
 0x7ba   :  { %4509 = vmatpush3.bf16.msra.mxu1 %v4508_v42 }
 0x7bb   :  { %4510 = vmatprep.subr.bf16.mxu1 %v5514_v34 }
 0x7bc   :  { %4494 = vmatpush3.bf16.msra.mxu0 %v4493_v61 }
 0x7bd   :  { %4495 = vmatprep.subr.bf16.mxu0 %v5514_v34 }
 0x7be   :  { %4512 = vmatpush3.bf16.msra.mxu1 %v4511_v13 }
 0x7bf   :  { %4513 = vmatprep.subr.bf16.mxu1 %v5514_v34 }
 0x7c0   :  { %4497 = vmatpush3.bf16.msra.mxu0 %v4496_v0 }
 0x7c2   :  { %4515 = vmatpush3.bf16.msra.mxu1 %v4514_v24 }
 0x7c3   :  { %4516 = vmatprep.subr.bf16.mxu1 %v5514_v34 }
 0x7c6   :  { %4518 = vmatpush3.bf16.msra.mxu1 %v4517_v37 }
 0x7c7   :  { %4519 = vmatprep.subr.bf16.mxu1 %v5514_v34  ;;  %v4612_v34 = vld [vmem:[%s5502_s4] ss:$0 sm:$0xff] }
 0x7ca   :  { %4521 = vmatpush3.bf16.msra.mxu1 %v4520_v51 }
 0x85f   :  { %v2126_v41 = vpop.f32.mrb[28].mxu1  ;;  %v2196_v44 = vpop.f32.mrb[38].mxu0 }
 0x860   :  { %v2200_v47 = vadd.f32 %v2126_v41, %v4997_v4  ;;  %v2207_v50 = vadd.f32 %v2196_v44, %v4999_v16  ;;  %v3757_v53 = vpop.f32.mrb[29].mxu1  ;;  %v3792_v56 = vpop.f32.mrb[39].mxu0 }
 0x862   :  { %v2519_v59 = vmul.f32 -1.442695, %v2200_v47  ;;  %v2520_v60 = vmul.f32 -1.442695, %v2207_v50 }
 0x864   :  { %4602 = vpow2.f32 %v2519_v59 }
 0x865   :  { %4604 = vpow2.f32 %v2520_v60 }
 0x86e   :  { %v4603_v5 = vpop.eup %4602 }
 0x86f   :  { %v2204_v54 = vadd.f32 1.0, %v4603_v5  ;;  %v4605_v58 = vpop.eup %4604 }
 0x870   :  { %v2211_v33 = vadd.f32 1.0, %v4605_v58 }
 0x871   :  { %4606 = vrcp.f32 %v2204_v54 }
 0x872   :  { %4608 = vrcp.f32 %v2211_v33 }
 0x87b   :  { %v4607_v14 = vpop.eup %4606 }
 0x87c   :  { %v4609_v6 = vpop.eup %4608 }
 0x87d   :  { %v2287_v10 = vsub.f32 1.0, %v4609_v6  ;;  %v2289_v23 = vmul.f32 %v4609_v6, %v5393_v18 }
 0x87f   :  { %v2280_v57 = vpop.f32.mrb[30].mxu1 }
 0x880   :  { %v2281_v62 = vadd.f32 %v4612_v34, %v2280_v57  ;;  %v3827_v4 = vpop.f32.mrb[31].mxu1 }
 0x882   :  { %v2284_v16 = vmul.f32 %v4607_v14, %v2281_v62 }
 0x884   :  { %v2285_v3 = vadd.f32 %v2284_v16, %v5515_v63 }
 0x886   :  { %4610 = vtanh.f32 %v2285_v3 }
 0x890   :  { %v4611_v15 = vpop.eup %4610 }
 0x891   :  { %v2288_v19 = vmul.f32 %v4611_v15, %v2287_v10 }
 0x893   :  { %v2290_v27 = vadd.f32 %v2289_v23, %v2288_v19 }
 0x895   :  { %3861 = vmatmul.mubr.f32.vlgmr.msra.gmra.mrb[40].mxu0 %v2290_v27 }
 0x968   :  { %v2380_v1 = vpop.f32.mrb[40].mxu0 }
 0x969   :  { %v2381_v11 = vadd.f32 %v2521_v2, %v2380_v1  ;;  %v3862_v46 = vpop.f32.mrb[41].mxu0 }
 0x96b   :  { %v2384_v38 = vmax.f32 %v2381_v11, 0.0 }
 0x96d   :  { %3896 = vmatmul.mubr.f32.vlgmr.msra.gmra.mrb[32].mxu1 %v2384_v38 }
 0xa40   :  { %v2474_v18 = vpop.f32.mrb[32].mxu1 }
 0xa41   :  { %v2475_v39 = vadd.f32 %v2522_v40, %v2474_v18  ;;  %v3897_v55 = vpop.f32.mrb[33].mxu1 }
 0xa43   :  { %2478 = vst [vmem:[%s5507_s9] sm:$0xff] %v2475_v39 }
 0xa44   :  { %2483 = vsyncpa [#allocation4], 1 }
 0xa45   :  { %2484 = vsyncpa [#allocation6], 1 }

</bundles_post_ra>
